<compile_context>
chip_gen: v7x
topology: tpu7x:2x2x1
jax: 0.10.0
libtpu: 0.0.40
codegen_flags: <defaults>
</compile_context>

<pallas_src>
import functools

import jax
import jax.numpy as jnp
import numpy as np
from jax.experimental import pallas as pl
from jax.experimental.pallas import tpu as pltpu

_SQRT_HALF = np.float32(0.7071067811865476)


def _layernorm(z, g, b):
    # matches torch.nn.LayerNorm: biased variance, eps=1e-5; single (z - mu) reuse
    mu = jnp.mean(z, axis=-1, keepdims=True)
    zc = z - mu
    var = jnp.mean(zc * zc, axis=-1, keepdims=True)
    return zc * jax.lax.rsqrt(var + 1e-5) * g + b


# ----------------------------------------------------------------------------
# Kernel: one grid step == (one batch element, one transformer layer).
# The residual stream for the current batch element lives in o_ref (VMEM) for
# the whole depth loop.
# ----------------------------------------------------------------------------
def _transformer_kernel(x_ref, ln1g_ref, ln1b_ref, wqkv_ref, wout_ref, bout_ref,
                        ln2g_ref, ln2b_ref, w1_ref, b1_ref, w2_ref, b2_ref,
                        o_ref, *, heads, dim_head):
    _, N, D = o_ref.shape
    hd = heads * dim_head
    scale = dim_head ** -0.5

    # Seed the resident activation for this batch block on the first layer.
    @pl.when(pl.program_id(1) == 0)
    def _():
        o_ref[...] = x_ref[...]

    x = o_ref[...].astype(jnp.float32).reshape(N, D)            # (N, D) f32

    # ---------------- PreNorm + multi-head Attention ----------------
    xn = _layernorm(x, ln1g_ref[0], ln1b_ref[0])                 # (N, D) f32

    # Fused, lane-dense QKV projection (bf16 operands, f32 accumulation).
    qkv = jnp.dot(xn.astype(jnp.bfloat16), wqkv_ref[0],
                  preferred_element_type=jnp.float32)            # (N, 3*hd) f32

    # Head split via static lane slices + leading-dim stack
    # (no minor-dim reshape / transpose relayouts).
    def split_heads(base):
        return jnp.stack(
            [qkv[:, base + h * dim_head: base + (h + 1) * dim_head]
             for h in range(heads)], axis=0)                     # (heads, N, dh)

    qh = split_heads(0 * hd).astype(jnp.bfloat16)
    kh = split_heads(1 * hd).astype(jnp.bfloat16)
    vh = split_heads(2 * hd).astype(jnp.bfloat16)

    dots = jnp.einsum('hid,hjd->hij', qh, kh,
                      preferred_element_type=jnp.float32) * scale  # (heads, N, N)
    mx = jnp.max(dots, axis=-1, keepdims=True)
    e = jnp.exp(dots - mx)                                         # f32 softmax
    attn = e * pl.reciprocal(jnp.sum(e, axis=-1, keepdims=True), approx=True)
    ctx = jnp.einsum('hij,hjd->hid', attn.astype(jnp.bfloat16), vh,
                     preferred_element_type=jnp.float32)           # (heads, N, dh)

    # Re-join heads along lanes and apply one fused output projection:
    # concat(head_outs) @ W_out  (mathematically identical to torch's concat+Linear).
    ctx_flat = jnp.concatenate([ctx[h] for h in range(heads)], axis=-1)  # (N, hd)
    attn_out = jnp.dot(ctx_flat.astype(jnp.bfloat16), wout_ref[0],
                       preferred_element_type=jnp.float32) + bout_ref[0]
    x = x + attn_out                                               # residual (f32)

    # ---------------- PreNorm + FeedForward ----------------
    xn2 = _layernorm(x, ln2g_ref[0], ln2b_ref[0])
    h1 = jnp.dot(xn2.astype(jnp.bfloat16), w1_ref[0],
                 preferred_element_type=jnp.float32) + b1_ref[0]
    # exact GELU (torch.nn.GELU default): 0.5*x*(1+erf(x/sqrt(2)))
    h1 = 0.5 * h1 * (1.0 + jax.lax.erf(h1 * _SQRT_HALF))
    h2 = jnp.dot(h1.astype(jnp.bfloat16), w2_ref[0],
                 preferred_element_type=jnp.float32) + b2_ref[0]
    x = x + h2                                                     # residual (f32)

    o_ref[...] = x.reshape(1, N, D).astype(o_ref.dtype)


# ----------------------------------------------------------------------------
# Wrapper: single pallas_call, grid = (batch, depth); weights stacked on axis 0.
# ----------------------------------------------------------------------------
def transformer_forward(x, params, *, heads, dim_head):
    B, N, D = x.shape
    depth = params[0].shape[0]
    kernel = functools.partial(_transformer_kernel, heads=heads, dim_head=dim_head)

    def wspec(p):
        nd = p.ndim
        return pl.BlockSpec((1,) + p.shape[1:],
                            lambda b, l, _nd=nd: (l,) + (0,) * (_nd - 1))

    act_spec = pl.BlockSpec((1, N, D), lambda b, l: (b, 0, 0))

    # VMEM budget: double-buffered per-layer weight slab + activation blocks
    # + headroom for in-kernel intermediates.  Clamp to 64 MiB so the same
    # request fits v5e/v6e (128 MiB) and v7x (64 MiB).
    per_layer_bytes = sum(int(np.prod(p.shape[1:])) * p.dtype.itemsize for p in params)
    act_bytes = N * D * x.dtype.itemsize
    vmem_limit = int(2 * per_layer_bytes + 4 * act_bytes) + (8 << 20)
    vmem_limit = min(max(vmem_limit, 32 << 20), 64 << 20)

    return pl.pallas_call(
        kernel,
        out_shape=jax.ShapeDtypeStruct((B, N, D), x.dtype),
        grid=(B, depth),
        in_specs=[act_spec] + [wspec(p) for p in params],
        out_specs=act_spec,
        compiler_params=pltpu.CompilerParams(
            # batch is independent (megacore-shardable on v7x); depth carries
            # the VMEM-resident residual stream, so it must be sequential.
            dimension_semantics=("parallel", "arbitrary"),
            vmem_limit_bytes=vmem_limit),
    )(x, *params)


# ----------------------------------------------------------------------------
# Plain-JAX reference (same stacked-weight layout) for correctness check.
# ----------------------------------------------------------------------------
def transformer_reference(x, params, *, heads, dim_head):
    ln1g, ln1b, wqkv, wout, bout, ln2g, ln2b, w1, b1, w2, b2 = params
    depth = ln1g.shape[0]
    B, N, D = x.shape
    hd = heads * dim_head
    scale = dim_head ** -0.5
    f32 = jnp.float32

    def ln(z, g, b):
        mu = jnp.mean(z, axis=-1, keepdims=True)
        zc = z - mu
        var = jnp.mean(zc * zc, axis=-1, keepdims=True)
        return zc * jax.lax.rsqrt(var + 1e-5) * g + b

    for l in range(depth):
        xn = ln(x, ln1g[l, 0], ln1b[l, 0])
        qkv = jnp.einsum('bnd,de->bne', xn, wqkv[l].astype(f32))
        q = qkv[..., 0 * hd:1 * hd].reshape(B, N, heads, dim_head).transpose(0, 2, 1, 3)
        k = qkv[..., 1 * hd:2 * hd].reshape(B, N, heads, dim_head).transpose(0, 2, 1, 3)
        v = qkv[..., 2 * hd:3 * hd].reshape(B, N, heads, dim_head).transpose(0, 2, 1, 3)
        dots = jnp.einsum('bhid,bhjd->bhij', q, k) * scale
        attn = jax.nn.softmax(dots, axis=-1)
        ctx = jnp.einsum('bhij,bhjd->bhid', attn, v)
        ctx = ctx.transpose(0, 2, 1, 3).reshape(B, N, hd)
        x = x + jnp.einsum('bne,ed->bnd', ctx, wout[l].astype(f32)) + bout[l, 0]
        xn2 = ln(x, ln2g[l, 0], ln2b[l, 0])
        h1 = jnp.einsum('bnd,dh->bnh', xn2, w1[l].astype(f32)) + b1[l, 0]
        h1 = 0.5 * h1 * (1.0 + jax.lax.erf(h1 * _SQRT_HALF))
        x = x + jnp.einsum('bnh,hd->bnd', h1, w2[l].astype(f32)) + b2[l, 0]
    return x


# ----------------------------------------------------------------------------
# Deterministic parameter init (synthetic weights, stacked over depth).
# Matmul weights stored in bf16 (HBM bandwidth / VMEM footprint), LN params
# and biases in f32 (added on the f32 VPU path).
# ----------------------------------------------------------------------------
def init_params(key, depth, dim, heads, dim_head, mlp_dim):
    s = 0.05
    hd = heads * dim_head
    ks = jax.random.split(key, 6)
    f32, bf16 = jnp.float32, jnp.bfloat16
    return (
        jnp.ones((depth, 1, dim), f32),                                        # ln1 gamma
        jnp.zeros((depth, 1, dim), f32),                                       # ln1 beta
        (jax.random.normal(ks[0], (depth, dim, 3 * hd)) * s).astype(bf16),     # W_qkv (fused)
        (jax.random.normal(ks[1], (depth, hd, dim)) * s).astype(bf16),         # W_out (flattened)
        (jax.random.normal(ks[2], (depth, 1, dim)) * s).astype(f32),           # b_out
        jnp.ones((depth, 1, dim), f32),                                        # ln2 gamma
        jnp.zeros((depth, 1, dim), f32),                                       # ln2 beta
        (jax.random.normal(ks[3], (depth, dim, mlp_dim)) * s).astype(bf16),    # W1
        (jax.random.normal(ks[4], (depth, 1, mlp_dim)) * s).astype(f32),       # b1
        (jax.random.normal(ks[5], (depth, mlp_dim, dim)) * s).astype(bf16),    # W2
        jnp.zeros((depth, 1, dim), f32),                                       # b2
    )


if __name__ == "__main__":
    # Small shapes consistent with Transformer(dim, depth, heads, dim_head, mlp_dim)
    B, N = 2, 8
    dim, depth, heads, dim_head, mlp_dim = 32, 2, 4, 8, 64

    key = jax.random.PRNGKey(0)
    kx, kp = jax.random.split(key)
    x = jax.random.normal(kx, (B, N, dim), dtype=jnp.float32)
    params = init_params(kp, depth, dim, heads, dim_head, mlp_dim)

    out = jax.block_until_ready(
        transformer_forward(x, params, heads=heads, dim_head=dim_head))
    ref = jax.block_until_ready(
        transformer_reference(x, params, heads=heads, dim_head=dim_head))

    np.testing.assert_allclose(np.asarray(out, dtype=np.float32),
                               np.asarray(ref, dtype=np.float32),
                               rtol=5e-2, atol=5e-2)
    print("KERNEL_OK")
</pallas_src>

<mosaic_0001>
module attributes {stable_mosaic.version = 11 : i64} {
  func.func @_transformer_kernel(%arg0: i32, %arg1: i32, %arg2: memref<1x8x32xf32, #tpu.memory_space<vmem>>, %arg3: memref<1x1x32xf32, #tpu.memory_space<vmem>>, %arg4: memref<1x1x32xf32, #tpu.memory_space<vmem>>, %arg5: memref<1x32x96xbf16, #tpu.memory_space<vmem>>, %arg6: memref<1x32x32xbf16, #tpu.memory_space<vmem>>, %arg7: memref<1x1x32xf32, #tpu.memory_space<vmem>>, %arg8: memref<1x1x32xf32, #tpu.memory_space<vmem>>, %arg9: memref<1x1x32xf32, #tpu.memory_space<vmem>>, %arg10: memref<1x32x64xbf16, #tpu.memory_space<vmem>>, %arg11: memref<1x1x64xf32, #tpu.memory_space<vmem>>, %arg12: memref<1x64x32xbf16, #tpu.memory_space<vmem>>, %arg13: memref<1x1x32xf32, #tpu.memory_space<vmem>>, %arg14: memref<1x8x32xf32, #tpu.memory_space<vmem>>) attributes {dimension_semantics = [#tpu.dimension_semantics<parallel>, #tpu.dimension_semantics<arbitrary>], iteration_bounds = array<i64: 2, 2>, scalar_prefetch = 0 : i64, scratch_operands = 0 : i64, tpu.core_type = #tpu.core_type<tc>, window_params = [{transform_indices = @transform_0, window_bounds = array<i64: 1, 8, 32>}, {transform_indices = @transform_1, window_bounds = array<i64: 1, 1, 32>}, {transform_indices = @transform_2, window_bounds = array<i64: 1, 1, 32>}, {transform_indices = @transform_3, window_bounds = array<i64: 1, 32, 96>}, {transform_indices = @transform_4, window_bounds = array<i64: 1, 32, 32>}, {transform_indices = @transform_5, window_bounds = array<i64: 1, 1, 32>}, {transform_indices = @transform_6, window_bounds = array<i64: 1, 1, 32>}, {transform_indices = @transform_7, window_bounds = array<i64: 1, 1, 32>}, {transform_indices = @transform_8, window_bounds = array<i64: 1, 32, 64>}, {transform_indices = @transform_9, window_bounds = array<i64: 1, 1, 64>}, {transform_indices = @transform_10, window_bounds = array<i64: 1, 64, 32>}, {transform_indices = @transform_11, window_bounds = array<i64: 1, 1, 32>}, {transform_indices = @transform_12, window_bounds = array<i64: 1, 8, 32>}]} {
    %c0_i32 = arith.constant 0 : i32
    %0 = arith.cmpi eq, %arg1, %c0_i32 : i32
    %1 = arith.extui %0 : i1 to i32
    %c0_i32_0 = arith.constant 0 : i32
    %2 = arith.cmpi ne, %1, %c0_i32_0 : i32
    scf.if %2 {
      %c0_60 = arith.constant 0 : index
      %c0_61 = arith.constant 0 : index
      %c0_62 = arith.constant 0 : index
      %147 = vector.load %arg2[%c0_60, %c0_61, %c0_62] : memref<1x8x32xf32, #tpu.memory_space<vmem>>, vector<1x8x32xf32>
      %c0_63 = arith.constant 0 : index
      %c0_64 = arith.constant 0 : index
      %c0_65 = arith.constant 0 : index
      %148 = vector.load %arg14[%c0_63, %c0_64, %c0_65] : memref<1x8x32xf32, #tpu.memory_space<vmem>>, vector<1x8x32xf32>
      tpu.vector_store %arg14[%c0_63, %c0_64, %c0_65], %147 {strides = array<i32>} : memref<1x8x32xf32, #tpu.memory_space<vmem>>, vector<1x8x32xf32>,
    } else {
    }
    %c0 = arith.constant 0 : index
    %c0_1 = arith.constant 0 : index
    %c0_2 = arith.constant 0 : index
    %3 = vector.load %arg14[%c0, %c0_1, %c0_2] : memref<1x8x32xf32, #tpu.memory_space<vmem>>, vector<1x8x32xf32>
    %4 = vector.shape_cast %3 : vector<1x8x32xf32> to vector<8x32xf32>
    %c0_3 = arith.constant 0 : index
    %c0_4 = arith.constant 0 : index
    %c0_5 = arith.constant 0 : index
    %5 = vector.load %arg3[%c0_3, %c0_4, %c0_5] : memref<1x1x32xf32, #tpu.memory_space<vmem>>, vector<1x1x32xf32>
    %6 = vector.shape_cast %5 : vector<1x1x32xf32> to vector<1x32xf32>
    %c0_6 = arith.constant 0 : index
    %c0_7 = arith.constant 0 : index
    %c0_8 = arith.constant 0 : index
    %7 = vector.load %arg4[%c0_6, %c0_7, %c0_8] : memref<1x1x32xf32, #tpu.memory_space<vmem>>, vector<1x1x32xf32>
    %8 = vector.shape_cast %7 : vector<1x1x32xf32> to vector<1x32xf32>
    %cst = arith.constant dense<0.000000e+00> : vector<8xf32>
    %9 = vector.multi_reduction <add>, %4, %cst [1] : vector<8x32xf32> to vector<8xf32>
    %10 = vector.shape_cast %9 : vector<8xf32> to vector<8x1xf32>
    %cst_9 = arith.constant 3.200000e+01 : f32
    %11 = vector.broadcast %cst_9 : f32 to vector<8x1xf32>
    %12 = arith.divf %10, %11 : vector<8x1xf32>
    %13 = vector.broadcast %12 : vector<8x1xf32> to vector<8x32xf32>
    %14 = arith.subf %4, %13 : vector<8x32xf32>
    %15 = arith.mulf %14, %14 : vector<8x32xf32>
    %cst_10 = arith.constant dense<0.000000e+00> : vector<8xf32>
    %16 = vector.multi_reduction <add>, %15, %cst_10 [1] : vector<8x32xf32> to vector<8xf32>
    %17 = vector.shape_cast %16 : vector<8xf32> to vector<8x1xf32>
    %cst_11 = arith.constant 3.200000e+01 : f32
    %18 = vector.broadcast %cst_11 : f32 to vector<8x1xf32>
    %19 = arith.divf %17, %18 : vector<8x1xf32>
    %cst_12 = arith.constant 9.99999974E-6 : f32
    %20 = vector.broadcast %cst_12 : f32 to vector<8x1xf32>
    %21 = arith.addf %19, %20 : vector<8x1xf32>
    %22 = math.rsqrt %21 : vector<8x1xf32>
    %23 = vector.broadcast %22 : vector<8x1xf32> to vector<8x32xf32>
    %24 = arith.mulf %14, %23 : vector<8x32xf32>
    %25 = vector.broadcast %6 : vector<1x32xf32> to vector<8x32xf32>
    %26 = arith.mulf %24, %25 : vector<8x32xf32>
    %27 = vector.broadcast %8 : vector<1x32xf32> to vector<8x32xf32>
    %28 = arith.addf %26, %27 : vector<8x32xf32>
    %29 = arith.truncf %28 : vector<8x32xf32> to vector<8x32xbf16>
    %c0_13 = arith.constant 0 : index
    %c0_14 = arith.constant 0 : index
    %c0_15 = arith.constant 0 : index
    %30 = vector.load %arg5[%c0_13, %c0_14, %c0_15] : memref<1x32x96xbf16, #tpu.memory_space<vmem>>, vector<1x32x96xbf16>
    %31 = vector.shape_cast %30 : vector<1x32x96xbf16> to vector<32x96xbf16>
    %cst_16 = arith.constant dense<0.000000e+00> : vector<8x96xf32>
    %32 = tpu.matmul %29, %31, %cst_16 {dimension_numbers = #tpu.dot_dimension_numbers<[1], [0], [0], [1], [0, 0, 1, 1], [], []>} : vector<8x32xbf16>, vector<32x96xbf16>, vector<8x96xf32> -> vector<8x96xf32>
    %33 = vector.extract_strided_slice %32 {offsets = [0, 0], sizes = [8, 8], strides = [1, 1]} : vector<8x96xf32> to vector<8x8xf32>
    %34 = vector.extract_strided_slice %32 {offsets = [0, 8], sizes = [8, 8], strides = [1, 1]} : vector<8x96xf32> to vector<8x8xf32>
    %35 = vector.extract_strided_slice %32 {offsets = [0, 16], sizes = [8, 8], strides = [1, 1]} : vector<8x96xf32> to vector<8x8xf32>
    %36 = vector.extract_strided_slice %32 {offsets = [0, 24], sizes = [8, 8], strides = [1, 1]} : vector<8x96xf32> to vector<8x8xf32>
    %37 = vector.shape_cast %33 : vector<8x8xf32> to vector<1x8x8xf32>
    %38 = vector.shape_cast %34 : vector<8x8xf32> to vector<1x8x8xf32>
    %39 = vector.shape_cast %35 : vector<8x8xf32> to vector<1x8x8xf32>
    %40 = vector.shape_cast %36 : vector<8x8xf32> to vector<1x8x8xf32>
    %41 = tpu.concatenate %37, %38, %39, %40 in 0 : vector<1x8x8xf32>, vector<1x8x8xf32>, vector<1x8x8xf32>, vector<1x8x8xf32> -> vector<4x8x8xf32>
    %42 = arith.truncf %41 : vector<4x8x8xf32> to vector<4x8x8xbf16>
    %43 = vector.extract_strided_slice %32 {offsets = [0, 32], sizes = [8, 8], strides = [1, 1]} : vector<8x96xf32> to vector<8x8xf32>
    %44 = vector.extract_strided_slice %32 {offsets = [0, 40], sizes = [8, 8], strides = [1, 1]} : vector<8x96xf32> to vector<8x8xf32>
    %45 = vector.extract_strided_slice %32 {offsets = [0, 48], sizes = [8, 8], strides = [1, 1]} : vector<8x96xf32> to vector<8x8xf32>
    %46 = vector.extract_strided_slice %32 {offsets = [0, 56], sizes = [8, 8], strides = [1, 1]} : vector<8x96xf32> to vector<8x8xf32>
    %47 = vector.shape_cast %43 : vector<8x8xf32> to vector<1x8x8xf32>
    %48 = vector.shape_cast %44 : vector<8x8xf32> to vector<1x8x8xf32>
    %49 = vector.shape_cast %45 : vector<8x8xf32> to vector<1x8x8xf32>
    %50 = vector.shape_cast %46 : vector<8x8xf32> to vector<1x8x8xf32>
    %51 = tpu.concatenate %47, %48, %49, %50 in 0 : vector<1x8x8xf32>, vector<1x8x8xf32>, vector<1x8x8xf32>, vector<1x8x8xf32> -> vector<4x8x8xf32>
    %52 = arith.truncf %51 : vector<4x8x8xf32> to vector<4x8x8xbf16>
    %53 = vector.extract_strided_slice %32 {offsets = [0, 64], sizes = [8, 8], strides = [1, 1]} : vector<8x96xf32> to vector<8x8xf32>
    %54 = vector.extract_strided_slice %32 {offsets = [0, 72], sizes = [8, 8], strides = [1, 1]} : vector<8x96xf32> to vector<8x8xf32>
    %55 = vector.extract_strided_slice %32 {offsets = [0, 80], sizes = [8, 8], strides = [1, 1]} : vector<8x96xf32> to vector<8x8xf32>
    %56 = vector.extract_strided_slice %32 {offsets = [0, 88], sizes = [8, 8], strides = [1, 1]} : vector<8x96xf32> to vector<8x8xf32>
    %57 = vector.shape_cast %53 : vector<8x8xf32> to vector<1x8x8xf32>
    %58 = vector.shape_cast %54 : vector<8x8xf32> to vector<1x8x8xf32>
    %59 = vector.shape_cast %55 : vector<8x8xf32> to vector<1x8x8xf32>
    %60 = vector.shape_cast %56 : vector<8x8xf32> to vector<1x8x8xf32>
    %61 = tpu.concatenate %57, %58, %59, %60 in 0 : vector<1x8x8xf32>, vector<1x8x8xf32>, vector<1x8x8xf32>, vector<1x8x8xf32> -> vector<4x8x8xf32>
    %62 = arith.truncf %61 : vector<4x8x8xf32> to vector<4x8x8xbf16>
    "tpu.trace_start"() <{level = 10 : i32, message = "hid,hjd->hij"}> : () -> ()
    %cst_17 = arith.constant dense<0.000000e+00> : vector<4x8x8xf32>
    %63 = tpu.matmul %42, %52, %cst_17 {dimension_numbers = #tpu.dot_dimension_numbers<[2], [2], [1], [1], [0, 0, 0, 1, 1, 1], [0], [0]>} : vector<4x8x8xbf16>, vector<4x8x8xbf16>, vector<4x8x8xf32> -> vector<4x8x8xf32>
    "tpu.trace_stop"() : () -> ()
    %cst_18 = arith.constant 0.353553385 : f32
    %64 = vector.broadcast %cst_18 : f32 to vector<4x8x8xf32>
    %65 = arith.mulf %63, %64 : vector<4x8x8xf32>
    %cst_19 = arith.constant dense<0xFF800000> : vector<4x8xf32>
    %66 = vector.multi_reduction <maximumf>, %65, %cst_19 [2] : vector<4x8x8xf32> to vector<4x8xf32>
    %67 = vector.shape_cast %66 : vector<4x8xf32> to vector<4x8x1xf32>
    %68 = vector.broadcast %67 : vector<4x8x1xf32> to vector<4x8x8xf32>
    %69 = arith.subf %65, %68 : vector<4x8x8xf32>
    %70 = math.exp %69 : vector<4x8x8xf32>
    %cst_20 = arith.constant dense<0.000000e+00> : vector<4x8xf32>
    %71 = vector.multi_reduction <add>, %70, %cst_20 [2] : vector<4x8x8xf32> to vector<4x8xf32>
    %72 = vector.shape_cast %71 : vector<4x8xf32> to vector<4x8x1xf32>
    %73 = tpu.reciprocal %72 {approx = true} : vector<4x8x1xf32> -> vector<4x8x1xf32>
    %74 = vector.broadcast %73 : vector<4x8x1xf32> to vector<4x8x8xf32>
    %75 = arith.mulf %70, %74 : vector<4x8x8xf32>
    %76 = arith.truncf %75 : vector<4x8x8xf32> to vector<4x8x8xbf16>
    "tpu.trace_start"() <{level = 10 : i32, message = "hij,hjd->hid"}> : () -> ()
    %cst_21 = arith.constant dense<0.000000e+00> : vector<4x8x8xf32>
    %77 = tpu.matmul %76, %62, %cst_21 {dimension_numbers = #tpu.dot_dimension_numbers<[2], [1], [1], [2], [0, 0, 0, 1, 1, 2], [0], [0]>} : vector<4x8x8xbf16>, vector<4x8x8xbf16>, vector<4x8x8xf32> -> vector<4x8x8xf32>
    "tpu.trace_stop"() : () -> ()
    %78 = vector.extract_strided_slice %77 {offsets = [0, 0, 0], sizes = [1, 8, 8], strides = [1, 1, 1]} : vector<4x8x8xf32> to vector<1x8x8xf32>
    %79 = vector.shape_cast %78 : vector<1x8x8xf32> to vector<8x8xf32>
    %80 = vector.extract_strided_slice %77 {offsets = [1, 0, 0], sizes = [1, 8, 8], strides = [1, 1, 1]} : vector<4x8x8xf32> to vector<1x8x8xf32>
    %81 = vector.shape_cast %80 : vector<1x8x8xf32> to vector<8x8xf32>
    %82 = vector.extract_strided_slice %77 {offsets = [2, 0, 0], sizes = [1, 8, 8], strides = [1, 1, 1]} : vector<4x8x8xf32> to vector<1x8x8xf32>
    %83 = vector.shape_cast %82 : vector<1x8x8xf32> to vector<8x8xf32>
    %84 = vector.extract_strided_slice %77 {offsets = [3, 0, 0], sizes = [1, 8, 8], strides = [1, 1, 1]} : vector<4x8x8xf32> to vector<1x8x8xf32>
    %85 = vector.shape_cast %84 : vector<1x8x8xf32> to vector<8x8xf32>
    %86 = tpu.concatenate %79, %81, %83, %85 in 1 : vector<8x8xf32>, vector<8x8xf32>, vector<8x8xf32>, vector<8x8xf32> -> vector<8x32xf32>
    %87 = arith.truncf %86 : vector<8x32xf32> to vector<8x32xbf16>
    %c0_22 = arith.constant 0 : index
    %c0_23 = arith.constant 0 : index
    %c0_24 = arith.constant 0 : index
    %88 = vector.load %arg6[%c0_22, %c0_23, %c0_24] : memref<1x32x32xbf16, #tpu.memory_space<vmem>>, vector<1x32x32xbf16>
    %89 = vector.shape_cast %88 : vector<1x32x32xbf16> to vector<32x32xbf16>
    %cst_25 = arith.constant dense<0.000000e+00> : vector<8x32xf32>
    %90 = tpu.matmul %87, %89, %cst_25 {dimension_numbers = #tpu.dot_dimension_numbers<[1], [0], [0], [1], [0, 0, 1, 1], [], []>} : vector<8x32xbf16>, vector<32x32xbf16>, vector<8x32xf32> -> vector<8x32xf32>
    %c0_26 = arith.constant 0 : index
    %c0_27 = arith.constant 0 : index
    %c0_28 = arith.constant 0 : index
    %91 = vector.load %arg7[%c0_26, %c0_27, %c0_28] : memref<1x1x32xf32, #tpu.memory_space<vmem>>, vector<1x1x32xf32>
    %92 = vector.shape_cast %91 : vector<1x1x32xf32> to vector<1x32xf32>
    %93 = vector.broadcast %92 : vector<1x32xf32> to vector<8x32xf32>
    %94 = arith.addf %90, %93 : vector<8x32xf32>
    %95 = arith.addf %4, %94 : vector<8x32xf32>
    %c0_29 = arith.constant 0 : index
    %c0_30 = arith.constant 0 : index
    %c0_31 = arith.constant 0 : index
    %96 = vector.load %arg8[%c0_29, %c0_30, %c0_31] : memref<1x1x32xf32, #tpu.memory_space<vmem>>, vector<1x1x32xf32>
    %97 = vector.shape_cast %96 : vector<1x1x32xf32> to vector<1x32xf32>
    %c0_32 = arith.constant 0 : index
    %c0_33 = arith.constant 0 : index
    %c0_34 = arith.constant 0 : index
    %98 = vector.load %arg9[%c0_32, %c0_33, %c0_34] : memref<1x1x32xf32, #tpu.memory_space<vmem>>, vector<1x1x32xf32>
    %99 = vector.shape_cast %98 : vector<1x1x32xf32> to vector<1x32xf32>
    %cst_35 = arith.constant dense<0.000000e+00> : vector<8xf32>
    %100 = vector.multi_reduction <add>, %95, %cst_35 [1] : vector<8x32xf32> to vector<8xf32>
    %101 = vector.shape_cast %100 : vector<8xf32> to vector<8x1xf32>
    %cst_36 = arith.constant 3.200000e+01 : f32
    %102 = vector.broadcast %cst_36 : f32 to vector<8x1xf32>
    %103 = arith.divf %101, %102 : vector<8x1xf32>
    %104 = vector.broadcast %103 : vector<8x1xf32> to vector<8x32xf32>
    %105 = arith.subf %95, %104 : vector<8x32xf32>
    %106 = arith.mulf %105, %105 : vector<8x32xf32>
    %cst_37 = arith.constant dense<0.000000e+00> : vector<8xf32>
    %107 = vector.multi_reduction <add>, %106, %cst_37 [1] : vector<8x32xf32> to vector<8xf32>
    %108 = vector.shape_cast %107 : vector<8xf32> to vector<8x1xf32>
    %cst_38 = arith.constant 3.200000e+01 : f32
    %109 = vector.broadcast %cst_38 : f32 to vector<8x1xf32>
    %110 = arith.divf %108, %109 : vector<8x1xf32>
    %cst_39 = arith.constant 9.99999974E-6 : f32
    %111 = vector.broadcast %cst_39 : f32 to vector<8x1xf32>
    %112 = arith.addf %110, %111 : vector<8x1xf32>
    %113 = math.rsqrt %112 : vector<8x1xf32>
    %114 = vector.broadcast %113 : vector<8x1xf32> to vector<8x32xf32>
    %115 = arith.mulf %105, %114 : vector<8x32xf32>
    %116 = vector.broadcast %97 : vector<1x32xf32> to vector<8x32xf32>
    %117 = arith.mulf %115, %116 : vector<8x32xf32>
    %118 = vector.broadcast %99 : vector<1x32xf32> to vector<8x32xf32>
    %119 = arith.addf %117, %118 : vector<8x32xf32>
    %120 = arith.truncf %119 : vector<8x32xf32> to vector<8x32xbf16>
    %c0_40 = arith.constant 0 : index
    %c0_41 = arith.constant 0 : index
    %c0_42 = arith.constant 0 : index
    %121 = vector.load %arg10[%c0_40, %c0_41, %c0_42] : memref<1x32x64xbf16, #tpu.memory_space<vmem>>, vector<1x32x64xbf16>
    %122 = vector.shape_cast %121 : vector<1x32x64xbf16> to vector<32x64xbf16>
    %cst_43 = arith.constant dense<0.000000e+00> : vector<8x64xf32>
    %123 = tpu.matmul %120, %122, %cst_43 {dimension_numbers = #tpu.dot_dimension_numbers<[1], [0], [0], [1], [0, 0, 1, 1], [], []>} : vector<8x32xbf16>, vector<32x64xbf16>, vector<8x64xf32> -> vector<8x64xf32>
    %c0_44 = arith.constant 0 : index
    %c0_45 = arith.constant 0 : index
    %c0_46 = arith.constant 0 : index
    %124 = vector.load %arg11[%c0_44, %c0_45, %c0_46] : memref<1x1x64xf32, #tpu.memory_space<vmem>>, vector<1x1x64xf32>
    %125 = vector.shape_cast %124 : vector<1x1x64xf32> to vector<1x64xf32>
    %126 = vector.broadcast %125 : vector<1x64xf32> to vector<8x64xf32>
    %127 = arith.addf %123, %126 : vector<8x64xf32>
    %cst_47 = arith.constant 5.000000e-01 : f32
    %128 = vector.broadcast %cst_47 : f32 to vector<8x64xf32>
    %129 = arith.mulf %128, %127 : vector<8x64xf32>
    %cst_48 = arith.constant 0.707106769 : f32
    %130 = vector.broadcast %cst_48 : f32 to vector<8x64xf32>
    %131 = arith.mulf %127, %130 : vector<8x64xf32>
    %132 = math.erf %131 : vector<8x64xf32>
    %cst_49 = arith.constant 1.000000e+00 : f32
    %133 = vector.broadcast %cst_49 : f32 to vector<8x64xf32>
    %134 = arith.addf %133, %132 : vector<8x64xf32>
    %135 = arith.mulf %129, %134 : vector<8x64xf32>
    %136 = arith.truncf %135 : vector<8x64xf32> to vector<8x64xbf16>
    %c0_50 = arith.constant 0 : index
    %c0_51 = arith.constant 0 : index
    %c0_52 = arith.constant 0 : index
    %137 = vector.load %arg12[%c0_50, %c0_51, %c0_52] : memref<1x64x32xbf16, #tpu.memory_space<vmem>>, vector<1x64x32xbf16>
    %138 = vector.shape_cast %137 : vector<1x64x32xbf16> to vector<64x32xbf16>
    %cst_53 = arith.constant dense<0.000000e+00> : vector<8x32xf32>
    %139 = tpu.matmul %136, %138, %cst_53 {dimension_numbers = #tpu.dot_dimension_numbers<[1], [0], [0], [1], [0, 0, 1, 1], [], []>} : vector<8x64xbf16>, vector<64x32xbf16>, vector<8x32xf32> -> vector<8x32xf32>
    %c0_54 = arith.constant 0 : index
    %c0_55 = arith.constant 0 : index
    %c0_56 = arith.constant 0 : index
    %140 = vector.load %arg13[%c0_54, %c0_55, %c0_56] : memref<1x1x32xf32, #tpu.memory_space<vmem>>, vector<1x1x32xf32>
    %141 = vector.shape_cast %140 : vector<1x1x32xf32> to vector<1x32xf32>
    %142 = vector.broadcast %141 : vector<1x32xf32> to vector<8x32xf32>
    %143 = arith.addf %139, %142 : vector<8x32xf32>
    %144 = arith.addf %95, %143 : vector<8x32xf32>
    %145 = vector.shape_cast %144 : vector<8x32xf32> to vector<1x8x32xf32>
    %c0_57 = arith.constant 0 : index
    %c0_58 = arith.constant 0 : index
    %c0_59 = arith.constant 0 : index
    %146 = vector.load %arg14[%c0_57, %c0_58, %c0_59] : memref<1x8x32xf32, #tpu.memory_space<vmem>>, vector<1x8x32xf32>
    tpu.vector_store %arg14[%c0_57, %c0_58, %c0_59], %145 {strides = array<i32>} : memref<1x8x32xf32, #tpu.memory_space<vmem>>, vector<1x8x32xf32>,
    return
  }
  func.func @transform_0(%arg0: i32, %arg1: i32) -> (i32, i32, i32) {
    %c0_i32 = arith.constant 0 : i32
    %c0_i32_0 = arith.constant 0 : i32
    %c0_i32_1 = arith.constant 0 : i32
    return %arg0, %c0_i32, %c0_i32_0 : i32, i32, i32
  }
  func.func @transform_1(%arg0: i32, %arg1: i32) -> (i32, i32, i32) {
    %c0_i32 = arith.constant 0 : i32
    %c0_i32_0 = arith.constant 0 : i32
    %c0_i32_1 = arith.constant 0 : i32
    return %arg1, %c0_i32, %c0_i32_0 : i32, i32, i32
  }
  func.func @transform_2(%arg0: i32, %arg1: i32) -> (i32, i32, i32) {
    %c0_i32 = arith.constant 0 : i32
    %c0_i32_0 = arith.constant 0 : i32
    %c0_i32_1 = arith.constant 0 : i32
    return %arg1, %c0_i32, %c0_i32_0 : i32, i32, i32
  }
  func.func @transform_3(%arg0: i32, %arg1: i32) -> (i32, i32, i32) {
    %c0_i32 = arith.constant 0 : i32
    %c0_i32_0 = arith.constant 0 : i32
    %c0_i32_1 = arith.constant 0 : i32
    return %arg1, %c0_i32, %c0_i32_0 : i32, i32, i32
  }
  func.func @transform_4(%arg0: i32, %arg1: i32) -> (i32, i32, i32) {
    %c0_i32 = arith.constant 0 : i32
    %c0_i32_0 = arith.constant 0 : i32
    %c0_i32_1 = arith.constant 0 : i32
    return %arg1, %c0_i32, %c0_i32_0 : i32, i32, i32
  }
  func.func @transform_5(%arg0: i32, %arg1: i32) -> (i32, i32, i32) {
    %c0_i32 = arith.constant 0 : i32
    %c0_i32_0 = arith.constant 0 : i32
    %c0_i32_1 = arith.constant 0 : i32
    return %arg1, %c0_i32, %c0_i32_0 : i32, i32, i32
  }
  func.func @transform_6(%arg0: i32, %arg1: i32) -> (i32, i32, i32) {
    %c0_i32 = arith.constant 0 : i32
    %c0_i32_0 = arith.constant 0 : i32
    %c0_i32_1 = arith.constant 0 : i32
    return %arg1, %c0_i32, %c0_i32_0 : i32, i32, i32
  }
  func.func @transform_7(%arg0: i32, %arg1: i32) -> (i32, i32, i32) {
    %c0_i32 = arith.constant 0 : i32
    %c0_i32_0 = arith.constant 0 : i32
    %c0_i32_1 = arith.constant 0 : i32
    return %arg1, %c0_i32, %c0_i32_0 : i32, i32, i32
  }
  func.func @transform_8(%arg0: i32, %arg1: i32) -> (i32, i32, i32) {
    %c0_i32 = arith.constant 0 : i32
    %c0_i32_0 = arith.constant 0 : i32
    %c0_i32_1 = arith.constant 0 : i32
    return %arg1, %c0_i32, %c0_i32_0 : i32, i32, i32
  }
  func.func @transform_9(%arg0: i32, %arg1: i32) -> (i32, i32, i32) {
    %c0_i32 = arith.constant 0 : i32
    %c0_i32_0 = arith.constant 0 : i32
    %c0_i32_1 = arith.constant 0 : i32
    return %arg1, %c0_i32, %c0_i32_0 : i32, i32, i32
  }
  func.func @transform_10(%arg0: i32, %arg1: i32) -> (i32, i32, i32) {
    %c0_i32 = arith.constant 0 : i32
    %c0_i32_0 = arith.constant 0 : i32
    %c0_i32_1 = arith.constant 0 : i32
    return %arg1, %c0_i32, %c0_i32_0 : i32, i32, i32
  }
  func.func @transform_11(%arg0: i32, %arg1: i32) -> (i32, i32, i32) {
    %c0_i32 = arith.constant 0 : i32
    %c0_i32_0 = arith.constant 0 : i32
    %c0_i32_1 = arith.constant 0 : i32
    return %arg1, %c0_i32, %c0_i32_0 : i32, i32, i32
  }
  func.func @transform_12(%arg0: i32, %arg1: i32) -> (i32, i32, i32) {
    %c0_i32 = arith.constant 0 : i32
    %c0_i32_0 = arith.constant 0 : i32
    %c0_i32_1 = arith.constant 0 : i32
    return %arg0, %c0_i32, %c0_i32_0 : i32, i32, i32
  }
}

</mosaic_0001>

<bundles_post_ra>
// kernel: tpu_custom_call.1
= control target key start
LH: loop header
LB: loop body
LE: loop exit
PB: predicated region body
PF: predicated region fallthrough
CT: control target
= control target key end

     0   :  { %s3053_s0 = inlined_call_operand.hbm [shape: f32[2,8,32], index: 0, kind: input, shape index: {}]   ;;  %s3054_s1 = inlined_call_operand.vmem [shape: f32[2,1,32], index: 1, kind: input, shape index: {}]   ;;  %s3055_s2 = inlined_call_operand.vmem [shape: f32[2,1,32], index: 2, kind: input, shape index: {}]   ;;  %s3056_s3 = inlined_call_operand.vmem [shape: bf16[2,32,96], index: 3, kind: input, shape index: {}]   ;;  %s3057_s4 = inlined_call_operand.vmem [shape: bf16[2,32,32], index: 4, kind: input, shape index: {}]   ;;  %s3058_s5 = inlined_call_operand.hbm [shape: f32[2,1,32], index: 5, kind: input, shape index: {}]   ;;  %s3059_s6 = inlined_call_operand.hbm [shape: f32[2,1,32], index: 6, kind: input, shape index: {}]   ;;  %s3060_s7 = inlined_call_operand.hbm [shape: f32[2,1,32], index: 7, kind: input, shape index: {}]   ;;  %s3061_s8 = inlined_call_operand.vmem [shape: bf16[2,32,64], index: 8, kind: input, shape index: {}]   ;;  %s3062_s9 = inlined_call_operand.hbm [shape: f32[2,1,64], index: 9, kind: input, shape index: {}]   ;;  %s3063_s10 = inlined_call_operand.vmem [shape: bf16[2,64,32], index: 10, kind: input, shape index: {}]   ;;  %s3064_s11 = inlined_call_operand.vmem [shape: f32[2,1,32], index: 11, kind: input, shape index: {}]   ;;  %s3065_s12 = inlined_call_operand.hbm [shape: f32[2,8,32], index: 12, kind: output, shape index: {}]  }
   0x1   :  { %3087 = sst [smem:[#allocation29_spill]] %s3053_s0 }
   0x2   :  { %3088 = sst [smem:[#allocation30_spill]] %s3054_s1 }
   0x3   :  { %3089 = sst [smem:[#allocation31_spill]] %s3055_s2 }
   0x4   :  { %3090 = sst [smem:[#allocation32_spill]] %s3056_s3 }
   0x5   :  { %3091 = sst [smem:[#allocation33_spill]] %s3057_s4 }
   0x6   :  { %3092 = sst [smem:[#allocation34_spill]] %s3058_s5 }
   0x7   :  { %3093 = sst [smem:[#allocation35_spill]] %s3059_s6 }
   0x8   :  { %3094 = sst [smem:[#allocation36_spill]] %s3060_s7 }
   0x9   :  { %3095 = sst [smem:[#allocation37_spill]] %s3061_s8 }
   0xa   :  { %3096 = sst [smem:[#allocation38_spill]] %s3062_s9 }
   0xb   :  { %3097 = sst [smem:[#allocation39_spill]] %s3063_s10 }
   0xc   :  { %3098 = sst [smem:[#allocation40_spill]] %s3064_s11 }
   0xd   :  { %3099 = sst [smem:[#allocation41_spill]] %s3065_s12 }
   0xe   :  { %17 = vsyncpa [#allocation3], 0 }
   0xf   :  { %19 = vsyncpa [#allocation3 + $0x1], 0 }
  0x10   :  { %20 = vsyncpa [#allocation6], 0 }
  0x11   :  { %22 = vsyncpa [#allocation6 + $0x1], 0 }
  0x12   :  { %23 = vsyncpa [#allocation9], 0 }
  0x13   :  { %25 = vsyncpa [#allocation9 + $0x1], 0 }
  0x14   :  { %26 = vsyncpa [#allocation4], 0 }
  0x15   :  { %28 = vsyncpa [#allocation4 + $0x1], 0  ;;  %s2465_s21 = smov 0   ;;  %s2467_s22 = smov 0  }
  0x16   :  { %s2469_s23 = smov 0   ;;  %s2471_s24 = smov 0  }
  0x17   :  { %s2473_s25 = smov 0   ;;  %s2475_s26 = smov 0  }
  0x18   :  { %s2477_s27 = smov 0   ;;  %s2479_s28 = smov 0  }
  0x19   :  { %s2481_s29 = smov 0   ;;  %s2483_s30 = smov 0  }
  0x1a   :  { %s2485_s13 = smov 0  }
  0x1b LB: > { %3100 = sst [smem:[#allocation16_spill]] %s2350_s23  ;;  %s43_s14 = sadd.s32 1, %s2374_s29  ;;  %s2382_s13 = sphi %s2485_s13, %s34_s13   ;;  %s2378_s30 = sphi %s2483_s30, %s3171_s30   ;;  %s2374_s29 = sphi %s2481_s29, %s3170_s29   ;;  %s2370_s28 = sphi %s2479_s28, %s3169_s28   ;;  %s2366_s27 = sphi %s2477_s27, %s3168_s27   ;;  %s2362_s26 = sphi %s2475_s26, %s3167_s26   ;;  %s2358_s25 = sphi %s2473_s25, %s3166_s25   ;;  %s2354_s24 = sphi %s2471_s24, %s3165_s24   ;;  %s2350_s23 = sphi %s2469_s23, %s3174_s23   ;;  %s2346_s22 = sphi %s2467_s22, %s3173_s22   ;;  %s2342_s21 = sphi %s2465_s21, %s3172_s21  }
  0x1c   : > { %3101 = sst [smem:[#allocation17_spill]] %s2358_s25  ;;  %p3071_p0 = scmp.eq.s32.totalorder %s2382_s13, 0 }
  0x1d   : > { %3102 = sst [smem:[#allocation18_spill]] %s2362_s26  ;;  %p2522_p1 = scmp.ge.s32.totalorder %s43_s14, 2 }
  0x1e   : > { %3103 = sst [smem:[#allocation19_spill]] %s2366_s27  ;;  %s183_s16 = sadd.s32 1, %s2350_s23 }
  0x1f   : > { %3104 = sst [smem:[#allocation20_spill]] %s2370_s28  ;;  %p190_p2 = scmp.ne.s32.totalorder %s2350_s23, %s2346_s22 }
  0x20   : > { %3105 = sst [smem:[#allocation21_spill]] %s2374_s29  ;;  %s3176_s14 = smov (%p2522_p1, %s43_s14), 0 }
  0x21   : > { %3106 = sst [smem:[#allocation22_spill]] %s2378_s30  ;;  %p192_p4 = por %p190_p2, %p3071_p0 }
  0x22   : > { %s3107_s15 = scalar_select %p2522_p1, 1, 0 }
  0x23   : > { %3108 = sst [smem:[#allocation23_spill]] %s3176_s14  ;;  %s180_s17 = ssub.s32 %s2374_s29, %s3176_s14 }
  0x24   : > { %p3070_p5 = scmp.lt.s32.totalorder %s2382_s13, 4  ;;  %p181_p6 = scmp.eq.s32.totalorder %s180_s17, 0 }
  0x25   : > { %s3072_s18 = sand.u32 1, %s2382_s13   ;;  %s2542_s19 = sand.u32 1, %s2350_s23  }
  0x26   : > { %s2545_s20 = scalar_select %p181_p6, %s2350_s23, %s183_s16  }
  0x27   : > { %s2548_s12 = sshll.u32 %s2374_s29, 4  ;;  %s3110_s5 = sld [smem:[#allocation34_spill]] }
  0x28   : > { %3109 = sst [smem:[#allocation24_spill]] %s2545_s20  ;;  %s451_s14 = scalar_lea.vmem [#allocation5], %s2542_s19 }
  0x29   : > { %s458_s17 = sshll.u32 %s451_s14, 4  ;;  %p2561_p7 = pnand %p3070_p5, %p192_p4  ;;  %s2557_s17 = int_to_ptr.vmem [resolvable:$true] %s458_s17 }
  0x2a   : > { %s2569_s11 = scalar_lea.sflag [#allocation6], %s3072_s18 }
  0x2b   : > { %s3111_s16 = scalar_select %p2561_p7, 1, 0 }
  0x2c   : > { %p2575_p11 = pneg %p2561_p7 }
  0x2d   : > { %s2554_s10 = scalar_lea.hbm %s3110_s5, %s2548_s12  ;;  %s2107_s23 = scalar_lea.hbm %s3110_s5, 32 }
  0x2e   : > { %s2102_s28 = scalar_lea.hbm %s2554_s10, 16  ;;  %p2108_p2 = scmp.lt.u32.totalorder %s2554_s10, %s3110_s5 }
  0x2f   : > { %p2103_p10 = scmp.ne.s32.totalorder %s2554_s10, %s2102_s28  ;;  %p2109_p4 = scmp.lt.u32.totalorder %s2107_s23, %s2102_s28 }
  0x30   : > { %p2111_p5 = scmp.lt.u32.totalorder %s2102_s28, %s2554_s10 }
  0x31   : > { %p2105_p12 = pnand %p2575_p11, %p2103_p10  ;;  %p2110_p6 = por %p2109_p4, %p2108_p2 }
  0x33   : > { %p2106_p13 = pneg %p2105_p12  ;;  %p2112_p3 = por %p2111_p5, %p2110_p6 }
  0x35   : > { %p2113_p0 = pnand %p2112_p3, %p2106_p13 }
  0x37   : > { %2116 = shalt.err (!%p2113_p0)
}
  0x38   : > { %s2117_s18 = scalar_lea.vmem %s2557_s17, 16  ;;  %s2384_s20 = smov [#allocation5]  }
  0x39   : > { %p2118_p10 = scmp.ne.s32.totalorder %s2557_s17, %s2117_s18  ;;  %s2122_s14 = sshll.u32 %s2384_s20, 4  ;;  %s2123_s14 = int_to_ptr.vmem [resolvable:$false] %s2122_s14 }
  0x3a   : > { %s2124_s4 = scalar_lea.vmem %s2123_s14, 32  ;;  %p2125_p9 = scmp.lt.s32.totalorder %s2557_s17, %s2123_s14 }
  0x3b   : > { %p2120_p12 = pnand %p2118_p10, %p2575_p11  ;;  %p2126_p1 = scmp.lt.s32.totalorder %s2124_s4, %s2117_s18 }
  0x3d   : > { %p2121_p8 = pneg %p2120_p12  ;;  %p2127_p2 = por %p2126_p1, %p2125_p9 }
  0x3f   : > { %p2128_p4 = pnand %p2127_p2, %p2121_p8 }
  0x41   : > { %2131 = shalt.err (!%p2128_p4)
}
  0x42   : > { %1956 = dma.hbm_to_vmem [thread:$0]  (!%p2561_p7), %s2554_s10, 16, %s2557_s17, %s2569_s11  }
  0x43   : > { %p3113_p0 = scmp.lt.s32.totalorder %s2382_s13, 5  ;;  %p3114_p3 = scmp.ge.s32.totalorder %s2382_s13, 1 }
  0x44   : > { %s3116_s7 = sld [smem:[#allocation36_spill]]  ;;  %s485_s20 = scalar_lea.vmem [#allocation8], %s2542_s19 }
  0x45   : > { %p2603_p5 = pnand %p3114_p3, %p3113_p0  ;;  %s492_s14 = sshll.u32 %s485_s20, 4  ;;  %s493_s14 = int_to_ptr.vmem [resolvable:$true] %s492_s14 }
  0x46   : > { %s3117_s4 = sand.u32 1, %s2382_s13  }
  0x47   : > { %s3115_s8 = scalar_select %p2603_p5, 1, 0 }
  0x48   : > { %s2616_s10 = scalar_lea.sflag [#allocation9], %s3117_s4 }
  0x4a   : > { %s2611_s28 = scalar_lea.hbm %s3116_s7, %s2548_s12  ;;  %s2137_s23 = scalar_lea.hbm %s3116_s7, 32 }
  0x4b   : > { %s2132_s17 = scalar_lea.hbm %s2611_s28, 16  ;;  %p2138_p13 = scmp.lt.u32.totalorder %s2611_s28, %s3116_s7 }
  0x4c   : > { %p2133_p1 = scmp.ne.s32.totalorder %s2611_s28, %s2132_s17  ;;  %p2139_p6 = scmp.lt.u32.totalorder %s2137_s23, %s2132_s17 }
  0x4d   : > { %p2141_p12 = scmp.lt.u32.totalorder %s2132_s17, %s2611_s28 }
  0x4e   : > { %p2135_p8 = pnand %p2133_p1, %p2575_p11  ;;  %p2140_p10 = por %p2139_p6, %p2138_p13 }
  0x50   : > { %p2136_p9 = pneg %p2135_p8  ;;  %p2142_p2 = por %p2141_p12, %p2140_p10 }
  0x52   : > { %p2143_p4 = pnand %p2142_p2, %p2136_p9 }
  0x54   : > { %2146 = shalt.err (!%p2143_p4)
}
  0x55   : > { %s2147_s20 = scalar_lea.vmem %s493_s14, 16  ;;  %s2385_s4 = smov [#allocation8]  }
  0x56   : > { %p2148_p0 = scmp.ne.s32.totalorder %s493_s14, %s2147_s20  ;;  %s2152_s1 = sshll.u32 %s2385_s4, 4  ;;  %s2153_s1 = int_to_ptr.vmem [resolvable:$false] %s2152_s1 }
  0x57   : > { %s2154_s3 = scalar_lea.vmem %s2153_s1, 32  ;;  %p2155_p8 = scmp.lt.s32.totalorder %s493_s14, %s2153_s1 }
  0x58   : > { %p2150_p3 = pnand %p2148_p0, %p2575_p11  ;;  %p2156_p5 = scmp.lt.s32.totalorder %s2154_s3, %s2147_s20 }
  0x5a   : > { %p2151_p1 = pneg %p2150_p3  ;;  %p2157_p7 = por %p2156_p5, %p2155_p8 }
  0x5c   : > { %p2158_p6 = pnand %p2157_p7, %p2151_p1 }
  0x5e   : > { %2161 = shalt.err (!%p2158_p6)
}
  0x5f   : > { %p3118_p13 = scmp.ne.s32.totalorder %s3111_s16, 0  ;;  %s2637_s1 = sadd.s32 4294967295, %s2382_s13  }
  0x60   : > { %s1766_s2 = sadd.s32 4294967294, %s2382_s13   ;;  %s46_s5 = sadd.s32 1, %s2378_s30 }
  0x61   : > { %1962 = dma.hbm_to_vmem [thread:$0]  (!%p3118_p13), %s2611_s28, 16, %s493_s14, %s2616_s10  }
  0x62   : > { %p3119_p7 = scmp.ne.s32.totalorder %s3107_s15, 0  ;;  %s53_s17 = sadd.s32 1, %s2362_s26 }
  0x63   : > { %p60_p5 = scmp.ne.s32.totalorder %s2362_s26, %s2358_s25  ;;  %p66_p10 = scmp.ne.s32.totalorder %s2358_s25, %s2354_s24 }
  0x64   : > { %s3178_s5 = smov (!%p3119_p7, %s46_s5), %s2378_s30  ;;  %p3120_p12 = scmp.eq.s32.totalorder %s2382_s13, 0 }
  0x65   : > { %p48_p9 = scmp.ge.s32.totalorder %s3178_s5, 2  ;;  %p67_p4 = scmp.eq.s32.totalorder %s2637_s1, 0 }
  0x66   : > { %p2651_p2 = por %p3120_p12, %p60_p5  ;;  %p3124_p3 = scmp.ne.s32.totalorder %s2346_s22, %s2342_s21 }
  0x67   : > { %s3180_s5 = smov (%p48_p9, %s3178_s5), 0  ;;  %p2661_p0 = por %p67_p4, %p66_p10 }
  0x68   : > { %3122 = sst [smem:[#allocation25_spill]] %s3180_s5  ;;  %p2668_p1 = por %p3124_p3, %p67_p4 }
  0x69   : > { %s3123_s15 = scalar_select %p2661_p0, 1, 0 }
  0x6a   : > { %s3125_s14 = scalar_select %p2668_p1, 1, 0 }
  0x6b   : > { %s50_s23 = ssub.s32 %s2378_s30, %s3180_s5  ;;  %p376_p8 = scmp.eq.s32.totalorder %s2637_s1, 3 }
  0x6c   : > { %3126 = sst [smem:[#allocation26_spill]] %s3125_s14  ;;  %p51_p6 = scmp.eq.s32.totalorder %s50_s23, 0 }
  0x6d   : > { %p382_p7 = scmp.eq.s32.totalorder %s1766_s2, 3  ;;  %p2675_p9 = por %p376_p8, %p60_p5 }
  0x6e   : > { %s402_s20 = sand.u32 1, %s2362_s26   ;;  %s1770_s7 = sshll.u32 %s2378_s30, 7 }
  0x6f   : > { %s3127_s18 = scalar_select %p2675_p9, 1, 0 }
  0x70   : > { %s2681_s4 = scalar_select %p51_p6, %s2362_s26, %s53_s17  }
  0x71   : > { %p2686_p12 = por %p382_p7, %p66_p10  ;;  %s1769_s21 = sshll.u32 %s402_s20, 3 }
  0x72   : > { %3128 = sst [smem:[#allocation27_spill]] %s2681_s4  ;;  %s3131_s0 = sld [smem:[#allocation29_spill]] }
  0x73   : > { %s3129_s3 = scalar_select %p2686_p12, 1, 0 }
  0x74   : > { %s406_s2 = scalar_lea.vmem [#allocation2], %s1769_s21  ;;  %p3132_p5 = scmp.lt.s32.totalorder %s2382_s13, 4 }
  0x75   : > { %3130 = sst [smem:[#allocation28_spill]] %s3129_s3  ;;  %s413_s23 = sshll.u32 %s406_s2, 4  ;;  %s2704_s23 = int_to_ptr.vmem [resolvable:$true] %s413_s23 }
  0x76   : > { %p2700_p4 = pnand %p3132_p5, %p2651_p2  ;;  %s3134_s6 = sld [smem:[#allocation35_spill]] }
  0x77   : > { %s403_s14 = scalar_lea.sflag [#allocation3], %s402_s20 }
  0x78   : > { %s2694_s5 = scalar_lea.hbm %s3131_s0, %s1770_s7  ;;  %p2164_p3 = pneg %p2700_p4 }
  0x79   : > { %s2162_s4 = scalar_lea.hbm %s2694_s5, 128  ;;  %s2167_s2 = scalar_lea.hbm %s3131_s0, 256 }
  0x7a   : > { %p2163_p10 = scmp.ne.s32.totalorder %s2694_s5, %s2162_s4  ;;  %p2168_p6 = scmp.lt.u32.totalorder %s2694_s5, %s3131_s0 }
  0x7b   : > { %p2169_p7 = scmp.lt.u32.totalorder %s2167_s2, %s2162_s4  ;;  %p2171_p12 = scmp.lt.u32.totalorder %s2162_s4, %s2694_s5 }
  0x7c   : > { %s2710_s7 = scalar_lea.hbm %s3134_s6, %s2548_s12  ;;  %p2165_p2 = pnand %p2164_p3, %p2163_p10 }
  0x7d   : > { %p2170_p5 = por %p2169_p7, %p2168_p6 }
  0x7e   : > { %p2166_p8 = pneg %p2165_p2 }
  0x7f   : > { %p2172_p9 = por %p2171_p12, %p2170_p5 }
  0x81   : > { %p2173_p1 = pnand %p2172_p9, %p2166_p8 }
  0x83   : > { %2176 = shalt.err (!%p2173_p1)
}
  0x84   : > { %s2177_s30 = scalar_lea.vmem %s2704_s23, 128  ;;  %s2386_s20 = smov [#allocation2]  }
  0x85   : > { %p2178_p10 = scmp.ne.s32.totalorder %s2704_s23, %s2177_s30  ;;  %s2182_s27 = sshll.u32 %s2386_s20, 4  ;;  %s2183_s27 = int_to_ptr.vmem [resolvable:$false] %s2182_s27 }
  0x86   : > { %s2184_s26 = scalar_lea.vmem %s2183_s27, 256  ;;  %p2185_p13 = scmp.lt.s32.totalorder %s2704_s23, %s2183_s27 }
  0x87   : > { %p2180_p2 = pnand %p2178_p10, %p2164_p3  ;;  %p2186_p6 = scmp.lt.s32.totalorder %s2184_s26, %s2177_s30 }
  0x89   : > { %p2181_p0 = pneg %p2180_p2  ;;  %p2187_p7 = por %p2186_p6, %p2185_p13 }
  0x8b   : > { %p2188_p12 = pnand %p2187_p7, %p2181_p0 }
  0x8d   : > { %2191 = shalt.err (!%p2188_p12)
}
  0x8e   : > { %1953 = dma.hbm_to_vmem [thread:$0]  (!%p2700_p4), %s2694_s5, 128, %s2704_s23, %s403_s14  }
  0x8f   : > { %s468_s4 = scalar_lea.vmem [#allocation7], %s2542_s19  ;;  %s3135_s9 = sld [smem:[#allocation38_spill]] }
  0x90   : > { %s475_s3 = sshll.u32 %s468_s4, 4  ;;  %s2192_s30 = scalar_lea.hbm %s2710_s7, 16  ;;  %s476_s3 = int_to_ptr.vmem [resolvable:$true] %s475_s3 }
  0x91   : > { %p2193_p13 = scmp.ne.s32.totalorder %s2710_s7, %s2192_s30  ;;  %s2197_s27 = scalar_lea.hbm %s3134_s6, 32 }
  0x92   : > { %p2198_p9 = scmp.lt.u32.totalorder %s2710_s7, %s3134_s6  ;;  %p2199_p4 = scmp.lt.u32.totalorder %s2197_s27, %s2192_s30 }
  0x93   : > { %p2195_p0 = pnand %p2193_p13, %p2575_p11  ;;  %p2201_p8 = scmp.lt.u32.totalorder %s2192_s30, %s2710_s7 }
  0x94   : > { %p2200_p3 = por %p2199_p4, %p2198_p9 }
  0x95   : > { %s2742_s2 = scalar_lea.hbm %s3135_s9, %s2548_s12  ;;  %p2196_p1 = pneg %p2195_p0 }
  0x96   : > { %p2202_p5 = por %p2201_p8, %p2200_p3 }
  0x98   : > { %p2203_p10 = pnand %p2202_p5, %p2196_p1 }
  0x9a   : > { %2206 = shalt.err (!%p2203_p10)
}
  0x9b   : > { %s2207_s12 = scalar_lea.vmem %s476_s3, 16  ;;  %s2387_s5 = smov [#allocation7]  }
  0x9c   : > { %p2208_p2 = scmp.ne.s32.totalorder %s476_s3, %s2207_s12  ;;  %s2212_s23 = sshll.u32 %s2387_s5, 4  ;;  %s2213_s23 = int_to_ptr.vmem [resolvable:$false] %s2212_s23 }
  0x9d   : > { %s2214_s14 = scalar_lea.vmem %s2213_s23, 32  ;;  %p2215_p12 = scmp.lt.s32.totalorder %s476_s3, %s2213_s23 }
  0x9e   : > { %p2210_p6 = pnand %p2208_p2, %p2575_p11  ;;  %p2216_p13 = scmp.lt.s32.totalorder %s2214_s14, %s2207_s12 }
  0xa0   : > { %p2211_p7 = pneg %p2210_p6  ;;  %p2217_p0 = por %p2216_p13, %p2215_p12 }
  0xa2   : > { %p2218_p4 = pnand %p2217_p0, %p2211_p7 }
  0xa4   : > { %2221 = shalt.err (!%p2218_p4)
}
  0xa5   : > { %p3136_p9 = scmp.ne.s32.totalorder %s3111_s16, 0  ;;  %s510_s0 = scalar_lea.vmem [#allocation10], %s2542_s19 }
  0xa6   : > { %s517_s4 = sshll.u32 %s510_s0, 4  ;;  %s2222_s28 = scalar_lea.hbm %s2742_s2, 16  ;;  %s518_s4 = int_to_ptr.vmem [resolvable:$true] %s517_s4 }
  0xa7   : > { %1959 = dma.hbm_to_vmem [thread:$0]  (!%p3136_p9), %s2710_s7, 16, %s476_s3, %s2569_s11  }
  0xa8   : > { %p2223_p1 = scmp.ne.s32.totalorder %s2742_s2, %s2222_s28  ;;  %s2227_s17 = scalar_lea.hbm %s3135_s9, 32 }
  0xa9   : > { %p2228_p5 = scmp.lt.u32.totalorder %s2742_s2, %s3135_s9  ;;  %p2229_p10 = scmp.lt.u32.totalorder %s2227_s17, %s2222_s28 }
  0xaa   : > { %p2225_p3 = pnand %p2223_p1, %p2575_p11  ;;  %p2231_p6 = scmp.lt.u32.totalorder %s2222_s28, %s2742_s2 }
  0xab   : > { %p2230_p2 = por %p2229_p10, %p2228_p5 }
  0xac   : > { %p2226_p8 = pneg %p2225_p3 }
  0xad   : > { %p2232_p7 = por %p2231_p6, %p2230_p2 }
  0xaf   : > { %p2233_p12 = pnand %p2232_p7, %p2226_p8 }
  0xb1   : > { %2236 = shalt.err (!%p2233_p12)
}
  0xb2   : > { %s2237_s19 = scalar_lea.vmem %s518_s4, 16  ;;  %s2388_s11 = smov [#allocation10]  }
  0xb3   : > { %p2238_p13 = scmp.ne.s32.totalorder %s518_s4, %s2237_s19  ;;  %s2242_s7 = sshll.u32 %s2388_s11, 4  ;;  %s2243_s7 = int_to_ptr.vmem [resolvable:$false] %s2242_s7 }
  0xb4   : > { %s2244_s3 = scalar_lea.vmem %s2243_s7, 32  ;;  %p2245_p1 = scmp.lt.s32.totalorder %s518_s4, %s2243_s7 }
  0xb5   : > { %p2240_p0 = pnand %p2238_p13, %p2575_p11  ;;  %p2246_p3 = scmp.lt.s32.totalorder %s2244_s3, %s2237_s19 }
  0xb7   : > { %p2241_p4 = pneg %p2240_p0  ;;  %p2247_p9 = por %p2246_p3, %p2245_p1 }
  0xb9   : > { %p2248_p5 = pnand %p2247_p9, %p2241_p4 }
  0xbb   : > { %2251 = shalt.err (!%p2248_p5)
}
  0xbc   : > { %p3137_p10 = scmp.ne.s32.totalorder %s3111_s16, 0  ;;  %p3138_p8 = scmp.ne.s32.totalorder %s3115_s8, 0 }
  0xbd   : > { %s2784_s29 = sand.u32 (!%p3138_p8), 1, %s2358_s25   ;;  %p3139_p11 = scmp.ne.s32.totalorder (!%p3138_p8), %s3123_s15, 0 }
  0xbe   : > { %1965 = dma.hbm_to_vmem [thread:$0]  (!%p3137_p10), %s2742_s2, 16, %s518_s4, %s2616_s10  }
  0xbf   : > { %540 = sbr.rel (%p3138_p8) target bundleno = 2862 (0xb2e), region = 68  ;;  %s1776_s26 = sshll.u32 (!%p3138_p8), %s2784_s29, 3 }
  0xc0   : > { %s543_s12 = scalar_lea.sflag (!%p3138_p8), [#allocation3], %s2784_s29  ;;  %s546_s5 = scalar_lea.vmem (!%p3138_p8), [#allocation2], %s1776_s26 }
  0xc6   : > { %2325 = dma.done.wait (%p3139_p11), %s543_s12, 128  }
  0xc7   : > { %2327 = vsyncadd (%p3139_p11), %s543_s12, 4294967168  ;;  %s3140_s16 = sld [smem:[#allocation26_spill]]  ;;  %s551_s10 = sand.u32 1, %s2637_s1  }
  0xc8   : > { %s2794_s8 = sand.u32 1, %s2346_s22   ;;  %s552_s2 = scalar_lea.sflag [#allocation6], %s551_s10 }
  0xcd   : > { %p3141_p9 = scmp.ne.s32.totalorder %s3140_s16, 0 }
  0xcf   : > { %2329 = dma.done.wait (%p3141_p9), %s552_s2, 32  }
  0xd0   : > { %2331 = vsyncadd (%p3141_p9), %s552_s2, 4294967264  ;;  %s568_s15 = scalar_lea.sflag [#allocation9], %s551_s10 }
  0xd1   : > { %2333 = dma.done.wait (%p3141_p9), %s568_s15, 32  }
  0xd2   : > { %2335 = vsyncadd (%p3141_p9), %s568_s15, 4294967264  ;;  %s3142_s1 = sld [smem:[#allocation19_spill]]  ;;  %s3145_s10 = sld [smem:[#allocation32_spill]] }
  0xd3   : > { %s3146_s14 = sld [smem:[#allocation33_spill]]  ;;  %s3147_s6 = sld [smem:[#allocation37_spill]] }
  0xd4   : > { %s3148_s20 = sld [smem:[#allocation39_spill]]  ;;  %s3149_s25 = sld [smem:[#allocation40_spill]] }
  0xd5   : > { %s578_s16 = scalar_lea.vmem [#allocation10], %s2794_s8 }
  0xd8   : > { %p664_p2 = scmp.lt.s32.totalorder %s3142_s1, 1  ;;  %p1786_p6 = scmp.ne.s32.totalorder %s3142_s1, 0 }
  0xd9   : > { %v698_v0 = vld [vmem:[%s546_s5] sm:$0xff] (!%p1786_p6)  ;;  %vm699_vm0 = vcmask (!%p1786_p6), 261120  }
  0xda   : > { %s2809_s4 = scalar_select %p664_p2, %s3142_s1, 1 }
  0xdb   : > { %697 = sbr.rel (%p1786_p6) target bundleno = 226 (0xe2), region = 92 }
  0xdc   : > { %s1820_s7 = sshll.u32 %s2809_s4, 4  ;;  %s1823_s3 = sshll.u32 %s2809_s4, 5 }
  0xdd   : > { %s674_s2 = scalar_lea.vmem %s3145_s10, %s1820_s7  ;;  %s2827_s23 = scalar_lea.vmem %s3146_s14, %s1820_s7 }
  0xde   : > { %s2832_s9 = scalar_lea.vmem %s3147_s6, %s1820_s7  ;;  %s2837_s27 = scalar_lea.vmem %s3148_s20, %s1823_s3 }
  0xdf   : > { %s692_s12 = scalar_lea.vmem %s3149_s25, %s2809_s4  ;;  %s2844_s10 = scalar_lea.vmem [#allocation11], %s1776_s26 }
  0xe0   : > { %700 = vst.msk [vmem:[%s2844_s10] sm:$0xff] (!%p1786_p6), %vm699_vm0, %v698_v0 }
  0xe2 PF: > { %vm704_vm1 = vcmask 261120   ;;  %v2070_v8 = vld [vmem:[%s674_s2] sm:$0xff]   ;;  %v2389_v9 = vmov 0.0   ;;  %vm2390_vm2 = vmmov 0   ;;  %v2071_v10 = vld [vmem:[%s674_s2 + $0x8] sm:$0xff]   ;;  %s3150_s26 = sld [smem:[#allocation30_spill]] }
  0xe3   : > { %1854 = vmatprep.subr.bf16.mxu0 %v2389_v9  ;;  %1858 = vmatprep.mubr.msk.bf16.mxu0 %vm2390_vm2, %v2389_v9  ;;  %s3152_s1 = sld [smem:[#allocation31_spill]]  ;;  %s2391_s11 = smov 104   ;;  %vm810_vm3 = vcmask 64512   ;;  %vm1061_vm4 = vcmask 1043456   ;;  %vm1262_vm5 = vcmask 130048   ;;  %vm1264_vm6 = vcmask 195584  }
  0xe4   : > { %1855 = vmatpush3.bf16.msra.mxu0 %v2070_v8  ;;  %1862 = vmatprep.subr.bf16.mxu1 %v2389_v9  ;;  %s2392_s7 = smov 120   ;;  %s2393_s3 = smov 112   ;;  %vm1475_vm7 = vcmask 523264  }
  0xe5   : > { %1856 = vmatprep.subr.bf16.mxu0 %v2389_v9  ;;  %1864 = vmatprep.mubr.msk.bf16.mxu1 %vm2390_vm2, %v2389_v9  ;;  %s2394_s2 = smov 96   ;;  %s2395_s15 = smov 64  }
  0xe6   : > { %s2396_s28 = smov 8   ;;  %s2397_s21 = smov 16  }
  0xe7   : > { %v2849_v1 = vld [vmem:[%s2844_s10] sm:$0xff]  ;;  %s2398_s30 = smov 24   ;;  %s3155_s20 = scalar_lea.vmem [#allocation7], %s2794_s8 }
  0xe8   : > { %v705_v2 = vsel %vm704_vm1, %v2849_v1, 0.0  ;;  %1857 = vmatpush3.bf16.msra.mxu0 %v2071_v10  ;;  %s3151_s5 = scalar_lea.vmem %s3150_s26, %s2809_s4  ;;  %s3156_s19 = scalar_lea.vmem [#allocation8], %s2794_s8 }
  0xe9   : > { %706 = vadd.xlane.f32.xlu0 %v705_v2  ;;  %1868 = vmatprep.subr.bf16.mxu0 %v2389_v9  ;;  %v1787_v15 = vld [vmem:[%s3151_s5] ss:$0 sm:$0xff]  ;;  %s3153_s17 = scalar_lea.vmem %s3152_s1, %s2809_s4  ;;  %s1535_s25 = sshll.u32 %s2844_s10, 4  ;;  %s2990_s25 = int_to_ptr.vmem [resolvable:$true] %s1535_s25 }
  0xea   : > { %v1788_v17 = vld [vmem:[%s3153_s17] ss:$0 sm:$0xff]  ;;  %s3159_s14 = sld [smem:[#allocation41_spill]]  ;;  %s1522_s4 = scalar_lea.sflag [#allocation4], %s2784_s29 }
  0xeb   : > { %p3160_p12 = scmp.ne.s32.totalorder %s3127_s18, 0  ;;  %s2399_s1 = smov [#allocation11]  }
  0xec   : > { %s2256_s17 = sshll.u32 %s2399_s1, 4  ;;  %s2257_s17 = int_to_ptr.vmem [resolvable:$false] %s2256_s17 }
  0xed   : > { %p2259_p4 = scmp.lt.s32.totalorder %s2990_s25, %s2257_s17 }
 0x176   : > { %v707_v3 = vpop.xlane.xlu0 %706 }
 0x177   : > { %v709_v4 = vmul.f32 0.03125, %v707_v3 }
 0x179   : > { %v710_v5 = vsub.f32 %v2849_v1, %v709_v4 }
 0x17b   : > { %v711_v6 = vmul.f32 %v710_v5, %v710_v5 }
 0x17d   : > { %v712_v7 = vsel %vm704_vm1, %v711_v6, 0.0 }
 0x17e   : > { %713 = vadd.xlane.f32.xlu0 %v712_v7 }
 0x20b   : > { %v714_v11 = vpop.xlane.xlu0 %713 }
 0x20c   : > { %v715_v12 = vmul.f32 0.03125, %v714_v11 }
 0x20e   : > { %v716_v13 = vadd.f32 1e-05, %v715_v12 }
 0x210   : > { %2080 = vrsqrt.f32 %v716_v13 }
 0x21a   : > { %v2081_v14 = vpop.eup %2080 }
 0x21b   : > { %v718_v16 = vmul.f32 %v2081_v14, %v710_v5 }
 0x21d   : > { %v725_v18 = vmul.f32 %v1787_v15, %v718_v16 }
 0x21f   : > { %v732_v19 = vadd.f32 %v1788_v17, %v725_v18 }
 0x221   : > { %v733_v20 = vpack.c.bf16 %v732_v19, %v732_v19 }
 0x223   : > { %1859 = vmatmul.mubr.msk.bf16.vlgmr.msra.gmra.mrb[0].mxu0 %vm704_vm1, %v733_v20 }
 0x224   : > { %1870 = vmatprep.mubr.msk.bf16.mxu0 %vm2390_vm2, %v2389_v9 }
 0x2f6   : > { %v787_v21 = vpop.f32.mrb[0].mxu0 }
 0x2f7   : > { %800 = vrot.lane.b32.xlu0 %v787_v21, %s2391_s11  ;;  %794 = vrot.lane.b32.xlu1 %v787_v21, %s2392_s7  ;;  %v1860_v22 = vpop.f32.mrb[1].mxu0  ;;  %v2876_v25 = vpack.c.bf16 %v787_v21, %v787_v21  ;;  %s2258_s11 = scalar_lea.vmem %s2257_s17, 256 }
 0x2f8   : > { %v790_v23 = vpop.f32.mrb[2].mxu0 }
 0x2f9   : > { %v1861_v24 = vpop.f32.mrb[3].mxu0 }
 0x2fb   : > { %797 = vrot.lane.b32.xlu1 %v787_v21, %s2393_s3 }
 0x2ff   : > { %808 = vrot.lane.b32.xlu1 %v2876_v25, %s2394_s2 }
 0x369   : > { %v795_v26 = vpop.permute.xlu1 %794  ;;  %v801_v30 = vpop.permute.xlu0 %800 }
 0x36a   : > { %v2879_v27 = vpack.c.bf16 %v795_v26, %v795_v26  ;;  %v2885_v32 = vpack.c.bf16 %v801_v30, %v801_v30 }
 0x36c   : > { %858 = vrot.lane.b32.xlu1 %v2879_v27, %s2394_s2 }
 0x36d   : > { %v798_v28 = vpop.permute.xlu1 %797 }
 0x36e   : > { %v2882_v29 = vpack.c.bf16 %v798_v28, %v798_v28 }
 0x370   : > { %907 = vrot.lane.b32.xlu1 %v2882_v29, %s2394_s2 }
 0x371   : > { %v809_v31 = vpop.permute.xlu1 %808 }
 0x372   : > { %v815_v33 = vsel %vm810_vm3, %v809_v31, 0 }
 0x373   : > { %1863 = vmatpush3.bf16.xpose.msra.mxu1 %v815_v33 }
 0x374   : > { %956 = vrot.lane.b32.xlu1 %v2885_v32, %s2394_s2  ;;  %1874 = vmatprep.subr.bf16.mxu1 %v2389_v9 }
 0x37a   : > { %1865 = vmatmul.mubr.msk.bf16.vlgmr.msra.gmra.mrb[0].mxu1 %vm810_vm3, %v2876_v25 }
 0x37b   : > { %1876 = vmatprep.mubr.msk.bf16.mxu1 %vm2390_vm2, %v2389_v9 }
 0x3de   : > { %v859_v34 = vpop.permute.xlu1 %858 }
 0x3df   : > { %v864_v35 = vsel %vm810_vm3, %v859_v34, 0 }
 0x3e0   : > { %1869 = vmatpush3.bf16.xpose.msra.mxu0 %v864_v35 }
 0x3e1   : > { %1880 = vmatprep.subr.bf16.mxu0 %v2389_v9 }
 0x3e2   : > { %v908_v36 = vpop.permute.xlu1 %907 }
 0x3e3   : > { %v913_v37 = vsel %vm810_vm3, %v908_v36, 0 }
 0x3e4   : > { %1875 = vmatpush3.bf16.xpose.msra.mxu1 %v913_v37 }
 0x3e5   : > { %1886 = vmatprep.subr.bf16.mxu1 %v2389_v9 }
 0x3e6   : > { %v957_v38 = vpop.permute.xlu1 %956 }
 0x3e7   : > { %v962_v39 = vsel %vm810_vm3, %v957_v38, 0  ;;  %1871 = vmatmul.mubr.msk.bf16.vlgmr.msra.gmra.mrb[4].mxu0 %vm810_vm3, %v2879_v27 }
 0x3e8   : > { %1881 = vmatpush3.bf16.xpose.msra.mxu0 %v962_v39  ;;  %1882 = vmatprep.mubr.msk.bf16.mxu0 %vm2390_vm2, %v2389_v9 }
 0x3e9   : > { %1892 = vmatprep.subr.bf16.mxu0 %v2389_v9 }
 0x3eb   : > { %1877 = vmatmul.mubr.msk.bf16.vlgmr.msra.gmra.mrb[4].mxu1 %vm810_vm3, %v2882_v29 }
 0x3ec   : > { %1888 = vmatprep.mubr.msk.bf16.mxu1 %vm2390_vm2, %v2389_v9 }
 0x3ef   : > { %1883 = vmatmul.mubr.msk.bf16.vlgmr.msra.gmra.mrb[8].mxu0 %vm810_vm3, %v2885_v32 }
 0x3f0   : > { %1894 = vmatprep.mubr.msk.bf16.mxu0 %vm2390_vm2, %v2389_v9 }
 0x44d   : > { %v851_v40 = vpop.f32.mrb[0].mxu1 }
 0x44e   : > { %v1004_v41 = vmul.f32 0.35355338, %v851_v40  ;;  %v1866_v42 = vpop.f32.mrb[1].mxu1 }
 0x44f   : > { %v854_v43 = vpop.f32.mrb[2].mxu1 }
 0x450   : > { %v1867_v44 = vpop.f32.mrb[3].mxu1  ;;  %v1008_v45 = vsel %vm810_vm3, %v1004_v41, -inf }
 0x451   : > { %1009 = vmax.xlane.f32.xlu1 %v1008_v45 }
 0x4ba   : > { %v900_v46 = vpop.f32.mrb[4].mxu0 }
 0x4bb   : > { %v1005_v47 = vmul.f32 0.35355338, %v900_v46  ;;  %v1872_v48 = vpop.f32.mrb[5].mxu0 }
 0x4bc   : > { %v903_v49 = vpop.f32.mrb[6].mxu0 }
 0x4bd   : > { %v1873_v50 = vpop.f32.mrb[7].mxu0  ;;  %v1011_v51 = vsel %vm810_vm3, %v1005_v47, -inf }
 0x4be   : > { %v949_v52 = vpop.f32.mrb[4].mxu1  ;;  %1012 = vmax.xlane.f32.xlu0 %v1011_v51  ;;  %v2072_v50 = vld [vmem:[%s2827_s23] sm:$0xff]   ;;  %v2073_v51 = vld [vmem:[%s2827_s23 + $0x8] sm:$0xff]   ;;  %s3154_s23 = scalar_lea.vmem [#allocation5], %s2794_s8 }
 0x4bf   : > { %v1006_v53 = vmul.f32 0.35355338, %v949_v52  ;;  %v1878_v54 = vpop.f32.mrb[5].mxu1 }
 0x4c0   : > { %v952_v55 = vpop.f32.mrb[6].mxu1 }
 0x4c1   : > { %v1879_v56 = vpop.f32.mrb[7].mxu1  ;;  %v1014_v57 = vsel %vm810_vm3, %v1006_v53, -inf }
 0x4c2   : > { %1015 = vmax.xlane.f32.xlu1 %v1014_v57  ;;  %v998_v58 = vpop.f32.mrb[8].mxu0 }
 0x4c3   : > { %v1007_v59 = vmul.f32 0.35355338, %v998_v58  ;;  %v1884_v60 = vpop.f32.mrb[9].mxu0 }
 0x4c4   : > { %v1001_v61 = vpop.f32.mrb[10].mxu0 }
 0x4c5   : > { %v1885_v62 = vpop.f32.mrb[11].mxu0  ;;  %v1017_v63 = vsel %vm810_vm3, %v1007_v59, -inf }
 0x4c6   : > { %1018 = vmax.xlane.f32.xlu0 %v1017_v63 }
 0x4d3   : > { %1056 = vrot.lane.b32.xlu1 %v2876_v25, %s2395_s15 }
 0x4de   : > { %v1010_v0 = vpop.xlane.xlu1 %1009 }
 0x4df   : > { %v1020_v2 = vsub.f32 %v1004_v41, %v1010_v0 }
 0x4e1   : > { %v1024_v3 = vmul.f32 1.442695, %v1020_v2 }
 0x4e3   : > { %2082 = vpow2.f32 %v1024_v3 }
 0x4ed   : > { %v2083_v4 = vpop.eup %2082 }
 0x4ee   : > { %v1032_v5 = vsel %vm810_vm3, %v2083_v4, 0.0 }
 0x4f7   : > { %1033 = vadd.xlane.f32.xlu1 %v1032_v5 }
 0x54b   : > { %v1013_v6 = vpop.xlane.xlu0 %1012 }
 0x54c   : > { %v1021_v7 = vsub.f32 %v1005_v47, %v1013_v6 }
 0x54e   : > { %v1026_v8 = vmul.f32 1.442695, %v1021_v7 }
 0x54f   : > { %v1016_v10 = vpop.xlane.xlu1 %1015 }
 0x550   : > { %2084 = vpow2.f32 %v1026_v8  ;;  %v1022_v11 = vsub.f32 %v1006_v53, %v1016_v10  ;;  %v1800_v8 = vld [vmem:[%s3154_s23] ss:$0 sm:$0xff] }
 0x552   : > { %v1028_v12 = vmul.f32 1.442695, %v1022_v11 }
 0x553   : > { %v1057_v13 = vpop.permute.xlu1 %1056  ;;  %v1019_v14 = vpop.xlane.xlu0 %1018 }
 0x554   : > { %2086 = vpow2.f32 %v1028_v12  ;;  %v1063_v15 = vsel %vm1061_vm4, %v1057_v13, 0  ;;  %v1023_v16 = vsub.f32 %v1007_v59, %v1019_v14 }
 0x555   : > { %1887 = vmatpush3.bf16.msra.mxu1 %v1063_v15 }
 0x556   : > { %v1030_v17 = vmul.f32 1.442695, %v1023_v16  ;;  %1898 = vmatprep.subr.bf16.mxu1 %v2389_v9 }
 0x558   : > { %2088 = vpow2.f32 %v1030_v17 }
 0x55a   : > { %v2085_v18 = vpop.eup %2084 }
 0x55b   : > { %v1035_v19 = vsel %vm810_vm3, %v2085_v18, 0.0 }
 0x55c   : > { %1036 = vadd.xlane.f32.xlu0 %v1035_v19 }
 0x55e   : > { %v2087_v20 = vpop.eup %2086 }
 0x55f   : > { %v1038_v21 = vsel %vm810_vm3, %v2087_v20, 0.0 }
 0x560   : > { %1039 = vadd.xlane.f32.xlu1 %v1038_v21 }
 0x562   : > { %v2089_v22 = vpop.eup %2088 }
 0x563   : > { %v1041_v23 = vsel %vm810_vm3, %v2089_v22, 0.0 }
 0x564   : > { %1042 = vadd.xlane.f32.xlu0 %v1041_v23  ;;  %v2075_v23 = vld [vmem:[%s2832_s9 + $0x8] sm:$0xff]  }
 0x571   : > { %1153 = vrot.lane.b32.xlu1 %v2882_v29, %s2395_s15 }
 0x575   : > { %1201 = vrot.lane.b32.xlu1 %v2885_v32, %s2395_s15 }
 0x57a   : > { %1105 = vrot.lane.b32.xlu0 %v2879_v27, %s2395_s15 }
 0x584   : > { %v1034_v24 = vpop.xlane.xlu1 %1033 }
 0x585   : > { %2090 = vrcp.f32 %v1034_v24 }
 0x58f   : > { %v2091_v25 = vpop.eup %2090 }
 0x590   : > { %v1048_v26 = vmul.f32 %v2091_v25, %v2083_v4 }
 0x592   : > { %v1052_v28 = vpack.c.bf16 %v1048_v26, %v1048_v26 }
 0x594   : > { %1889 = vmatmul.mubr.msk.bf16.vlgmr.msra.gmra.mrb[8].mxu1 %vm810_vm3, %v1052_v28  ;;  %v1804_v28 = vld [vmem:[%s3155_s20] ss:$0 sm:$0xff] }
 0x595   : > { %1900 = vmatprep.mubr.msk.bf16.mxu1 %vm2390_vm2, %v2389_v9 }
 0x5e9   : > { %v1037_v30 = vpop.xlane.xlu0 %1036 }
 0x5ea   : > { %2092 = vrcp.f32 %v1037_v30 }
 0x5ed   : > { %v1040_v31 = vpop.xlane.xlu1 %1039 }
 0x5ee   : > { %2094 = vrcp.f32 %v1040_v31  ;;  %v1805_v31 = vld [vmem:[%s3156_s19] ss:$0 sm:$0xff] }
 0x5f1   : > { %v1154_v29 = vpop.permute.xlu1 %1153  ;;  %v1043_v33 = vpop.xlane.xlu0 %1042 }
 0x5f2   : > { %v1159_v32 = vsel %vm1061_vm4, %v1154_v29, 0  ;;  %2096 = vrcp.f32 %v1043_v33 }
 0x5f3   : > { %1899 = vmatpush3.bf16.msra.mxu1 %v1159_v32 }
 0x5f4   : > { %v2093_v27 = vpop.eup %2092  ;;  %1910 = vmatprep.subr.bf16.mxu1 %v2389_v9 }
 0x5f5   : > { %v1049_v34 = vmul.f32 %v2093_v27, %v2085_v18  ;;  %v1106_v35 = vpop.permute.xlu0 %1105  ;;  %v1202_v37 = vpop.permute.xlu1 %1201  ;;  %v2076_v27 = vld [vmem:[%s2837_s27] sm:$0xff]  }
 0x5f6   : > { %v1111_v36 = vsel %vm1061_vm4, %v1106_v35, 0  ;;  %v1207_v41 = vsel %vm1061_vm4, %v1202_v37, 0  ;;  %v2078_v35 = vld [vmem:[%s2837_s27 + $0x10] sm:$0xff]   ;;  %v1806_v37 = vld [vmem:[%s578_s16] ss:$0 sm:$0xff] }
 0x5f7   : > { %1893 = vmatpush3.bf16.msra.mxu0 %v1111_v36  ;;  %v1053_v38 = vpack.c.bf16 %v1049_v34, %v1049_v34  ;;  %v2077_v34 = vld [vmem:[%s2837_s27 + $0x8] sm:$0xff]   ;;  %v2079_v36 = vld [vmem:[%s2837_s27 + $0x18] sm:$0xff]  }
 0x5f8   : > { %v2095_v39 = vpop.eup %2094  ;;  %1904 = vmatprep.subr.bf16.mxu0 %v2389_v9 }
 0x5f9   : > { %v1050_v40 = vmul.f32 %v2095_v39, %v2087_v20 }
 0x5fa   : > { %1895 = vmatmul.mubr.msk.bf16.vlgmr.msra.gmra.mrb[12].mxu0 %vm810_vm3, %v1053_v38 }
 0x5fb   : > { %1905 = vmatpush3.bf16.msra.mxu0 %v1207_v41  ;;  %v1054_v42 = vpack.c.bf16 %v1050_v40, %v1050_v40  ;;  %1906 = vmatprep.mubr.msk.bf16.mxu0 %vm2390_vm2, %v2389_v9 }
 0x5fc   : > { %v2097_v43 = vpop.eup %2096  ;;  %1918 = vmatprep.subr.bf16.mxu0 %v2389_v9 }
 0x5fd   : > { %v1051_v44 = vmul.f32 %v2097_v43, %v2089_v22  ;;  %1901 = vmatmul.mubr.msk.bf16.vlgmr.msra.gmra.mrb[12].mxu1 %vm810_vm3, %v1054_v42  ;;  %v2074_v22 = vld [vmem:[%s2832_s9] sm:$0xff]   ;;  %s3157_s9 = sld [smem:[#allocation20_spill]] }
 0x5fe   : > { %1914 = vmatprep.mubr.msk.bf16.mxu1 %vm2390_vm2, %v2389_v9  ;;  %1911 = vmatpush3.bf16.msra.mxu1 %v2072_v50 }
 0x5ff   : > { %v1055_v45 = vpack.c.bf16 %v1051_v44, %v1051_v44  ;;  %1912 = vmatprep.subr.bf16.mxu1 %v2389_v9 }
 0x602   : > { %1907 = vmatmul.mubr.msk.bf16.vlgmr.msra.gmra.mrb[16].mxu0 %vm810_vm3, %v1055_v45  ;;  %1913 = vmatpush3.bf16.msra.mxu1 %v2073_v51 }
 0x603   : > { %1922 = vmatprep.mubr.msk.bf16.mxu0 %vm2390_vm2, %v2389_v9  ;;  %1926 = vmatprep.subr.bf16.mxu1 %v2389_v9  ;;  %s1817_s6 = sshll.u32 %s3157_s9, 7 }
 0x604   : > { %1919 = vmatpush3.bf16.msra.mxu0 %v2074_v22  ;;  %s2988_s0 = scalar_lea.hbm %s3159_s14, %s1817_s6 }
 0x605   : > { %1920 = vmatprep.subr.bf16.mxu0 %v2389_v9 }
 0x608   : > { %1921 = vmatpush3.bf16.msra.mxu0 %v2075_v23 }
 0x667   : > { %v1099_v46 = vpop.f32.mrb[8].mxu1 }
 0x668   : > { %v1890_v47 = vpop.f32.mrb[9].mxu1 }
 0x669   : > { %v1102_v48 = vpop.f32.mrb[10].mxu1 }
 0x66a   : > { %v1891_v49 = vpop.f32.mrb[11].mxu1  ;;  %v1810_v48 = vld [vmem:[%s692_s12] ss:$0 sm:$0xff]  ;;  %s2252_s12 = scalar_lea.vmem %s2990_s25, 128 }
 0x66b   : > { %p2253_p7 = scmp.ne.s32.totalorder %s2990_s25, %s2252_s12  ;;  %p2260_p1 = scmp.lt.s32.totalorder %s2258_s11, %s2252_s12 }
 0x66d   : > { %p2254_p13 = pnand %p2253_p7, %p3160_p12  ;;  %p2261_p3 = por %p2260_p1, %p2259_p4 }
 0x66f   : > { %p2255_p0 = pneg %p2254_p13 }
 0x671   : > { %p2262_p5 = pnand %p2261_p3, %p2255_p0 }
 0x6cd   : > { %v1147_v52 = vpop.f32.mrb[12].mxu0 }
 0x6ce   : > { %1250 = vrot.lane.b32.xlu0 %v1147_v52, %s2396_s28  ;;  %v1896_v53 = vpop.f32.mrb[13].mxu0 }
 0x6cf   : > { %v1150_v54 = vpop.f32.mrb[14].mxu0 }
 0x6d0   : > { %v1897_v55 = vpop.f32.mrb[15].mxu0  ;;  %v1195_v56 = vpop.f32.mrb[12].mxu1 }
 0x6d1   : > { %1254 = vrot.lane.b32.xlu1 %v1195_v56, %s2397_s21  ;;  %v1902_v57 = vpop.f32.mrb[13].mxu1 }
 0x6d2   : > { %v1198_v58 = vpop.f32.mrb[14].mxu1 }
 0x6d3   : > { %v1903_v59 = vpop.f32.mrb[15].mxu1 }
 0x6d5   : > { %v1243_v60 = vpop.f32.mrb[16].mxu0 }
 0x6d6   : > { %1258 = vrot.lane.b32.xlu0 %v1243_v60, %s2398_s30  ;;  %v1908_v61 = vpop.f32.mrb[17].mxu0 }
 0x6d7   : > { %v1246_v62 = vpop.f32.mrb[18].mxu0 }
 0x6d8   : > { %v1909_v63 = vpop.f32.mrb[19].mxu0 }
 0x740   : > { %v1251_v0 = vpop.permute.xlu0 %1250 }
 0x741   : > { %v1261_v3 = vsel %vm810_vm3, %v1099_v46, %v1251_v0 }
 0x743   : > { %v1255_v2 = vpop.permute.xlu1 %1254 }
 0x744   : > { %v1263_v4 = vsel %vm1262_vm5, %v1261_v3, %v1255_v2 }
 0x748   : > { %v1259_v5 = vpop.permute.xlu0 %1258 }
 0x749   : > { %v1265_v6 = vsel %vm1264_vm6, %v1263_v4, %v1259_v5 }
 0x74a   : > { %v1266_v7 = vpack.c.bf16 %v1265_v6, %v1265_v6 }
 0x74c   : > { %1915 = vmatmul.mubr.msk.bf16.vlgmr.msra.gmra.mrb[16].mxu1 %vm704_vm1, %v1266_v7 }
 0x74d   : > { %1934 = vmatprep.mubr.msk.bf16.mxu1 %vm2390_vm2, %v2389_v9  ;;  %1927 = vmatpush3.bf16.msra.mxu1 %v2076_v27 }
 0x74e   : > { %1928 = vmatprep.subr.bf16.mxu1 %v2389_v9 }
 0x751   : > { %1929 = vmatpush3.bf16.msra.mxu1 %v2077_v34 }
 0x752   : > { %1930 = vmatprep.subr.bf16.mxu1 %v2389_v9 }
 0x755   : > { %1931 = vmatpush3.bf16.msra.mxu1 %v2078_v35 }
 0x756   : > { %1932 = vmatprep.subr.bf16.mxu1 %v2389_v9 }
 0x759   : > { %1933 = vmatpush3.bf16.msra.mxu1 %v2079_v36 }
 0x81f   : > { %v1327_v10 = vpop.f32.mrb[16].mxu1 }
 0x820   : > { %v1328_v11 = vadd.f32 %v1800_v8, %v1327_v10  ;;  %v1916_v12 = vpop.f32.mrb[17].mxu1 }
 0x821   : > { %v1330_v13 = vpop.f32.mrb[18].mxu1 }
 0x822   : > { %v1333_v14 = vadd.f32 %v1328_v11, %v2849_v1  ;;  %v1917_v15 = vpop.f32.mrb[19].mxu1 }
 0x824   : > { %v1336_v16 = vsel %vm704_vm1, %v1333_v14, 0.0 }
 0x825   : > { %1337 = vadd.xlane.f32.xlu1 %v1336_v16 }
 0x8b2   : > { %v1338_v17 = vpop.xlane.xlu1 %1337 }
 0x8b3   : > { %v1339_v18 = vmul.f32 0.03125, %v1338_v17 }
 0x8b5   : > { %v1340_v19 = vsub.f32 %v1333_v14, %v1339_v18 }
 0x8b7   : > { %v1341_v20 = vmul.f32 %v1340_v19, %v1340_v19 }
 0x8b9   : > { %v1342_v21 = vsel %vm704_vm1, %v1341_v20, 0.0 }
 0x8ba   : > { %1343 = vadd.xlane.f32.xlu0 %v1342_v21 }
 0x947   : > { %v1344_v1 = vpop.xlane.xlu0 %1343 }
 0x948   : > { %v1345_v24 = vmul.f32 0.03125, %v1344_v1 }
 0x94a   : > { %v1346_v25 = vadd.f32 1e-05, %v1345_v24 }
 0x94c   : > { %2098 = vrsqrt.f32 %v1346_v25 }
 0x956   : > { %v2099_v26 = vpop.eup %2098 }
 0x957   : > { %v1348_v30 = vmul.f32 %v2099_v26, %v1340_v19 }
 0x959   : > { %v1355_v29 = vmul.f32 %v1804_v28, %v1348_v30 }
 0x95b   : > { %v1362_v33 = vadd.f32 %v1805_v31, %v1355_v29 }
 0x95d   : > { %v1363_v32 = vpack.c.bf16 %v1362_v33, %v1362_v33 }
 0x95f   : > { %1923 = vmatmul.mubr.msk.bf16.vlgmr.msra.gmra.mrb[20].mxu0 %vm704_vm1, %v1363_v32 }
 0xa32   : > { %v1424_v38 = vpop.f32.mrb[20].mxu0 }
 0xa33   : > { %v1425_v39 = vadd.f32 %v1806_v37, %v1424_v38  ;;  %v1924_v40 = vpop.f32.mrb[21].mxu0 }
 0xa34   : > { %v1427_v41 = vpop.f32.mrb[22].mxu0 }
 0xa35   : > { %v1431_v42 = vmul.f32 0.70710677, %v1425_v39  ;;  %v1925_v43 = vpop.f32.mrb[23].mxu0  ;;  %v1430_v45 = vmul.f32 0.5, %v1425_v39 }
 0xa37   : > { %2100 = verf.f32 %v1431_v42 }
 0xa41   : > { %v2101_v44 = vpop.eup %2100 }
 0xa42   : > { %v1433_v46 = vadd.f32 1.0, %v2101_v44 }
 0xa44   : > { %v1434_v47 = vmul.f32 %v1433_v46, %v1430_v45 }
 0xa46   : > { %v1435_v9 = vpack.c.bf16 %v1434_v47, %v1434_v47 }
 0xa48   : > { %1935 = vmatmul.mubr.msk.bf16.vlgmr.msra.gmra.mrb[20].mxu1 %vm1475_vm7, %v1435_v9 }
 0xb1b   : > { %v1513_v49 = vpop.f32.mrb[20].mxu1 }
 0xb1c   : > { %v1514_v50 = vadd.f32 %v1810_v48, %v1513_v49  ;;  %v1936_v51 = vpop.f32.mrb[21].mxu1 }
 0xb1d   : > { %v1516_v52 = vpop.f32.mrb[22].mxu1 }
 0xb1e   : > { %v1519_v53 = vadd.f32 %v1514_v50, %v1333_v14  ;;  %v1937_v54 = vpop.f32.mrb[23].mxu1 }
 0xb20   : > { %1520 = vst.msk [vmem:[%s2844_s10] sm:$0xff] %vm704_vm1, %v1519_v53 }
 0xb21   : > { %2265 = shalt.err (!%p2262_p5)
}
 0xb22   : > { %s2266_s29 = scalar_lea.hbm %s2988_s0, 128  ;;  %s2270_s3 = scalar_lea.hbm %s3159_s14, 256 }
 0xb23   : > { %p2267_p10 = scmp.ne.s32.totalorder %s2988_s0, %s2266_s29  ;;  %p2271_p9 = scmp.lt.u32.totalorder %s2988_s0, %s3159_s14 }
 0xb24   : > { %p2272_p2 = scmp.lt.u32.totalorder %s2270_s3, %s2266_s29  ;;  %p2274_p7 = scmp.lt.u32.totalorder %s2266_s29, %s2988_s0 }
 0xb25   : > { %p2268_p8 = pnand %p2267_p10, %p3160_p12 }
 0xb26   : > { %p2273_p6 = por %p2272_p2, %p2271_p9 }
 0xb27   : > { %p2269_p11 = pneg %p2268_p8 }
 0xb28   : > { %p2275_p13 = por %p2274_p7, %p2273_p6 }
 0xb2a   : > { %p2276_p0 = pnand %p2275_p13, %p2269_p11 }
 0xb2c   : > { %2279 = shalt.err (!%p2276_p0)
}
 0xb2d   : > { %1948 = dma.vmem_to_hbm [thread:$0]  (%p3160_p12), %s2990_s25, 128, %s2988_s0, %s1522_s4  }
 0xb2e PF: > { %s3161_s28 = sld [smem:[#allocation28_spill]]  ;;  %p1971_p4 = scmp.ge.s32.totalorder %s2382_s13, 2 }
 0xb2f   : > { %s1547_s21 = sand.u32 1, %s2354_s24  }
 0xb30   : > { %s1548_s30 = scalar_lea.sflag [#allocation4], %s1547_s21 }
 0xb34   : > { %p3162_p1 = scmp.ne.s32.totalorder %s3161_s28, 0 }
 0xb36   : > { %p1967_p3 = pnand %p1971_p4, %p3162_p1 }
 0xb38   : > { %2337 = dma.done.wait (!%p1967_p3), %s1548_s30, 128  }
 0xb39   : > { %2339 = vsyncadd (!%p1967_p3), %s1548_s30, 4294967168  ;;  %s34_s13 = sadd.s32 1, %s2382_s13   ;;  %s3163_s23 = sld [smem:[#allocation16_spill]] }
 0xb3a   : > { %p31_p5 = scmp.ge.s32.totalorder %s34_s13, 6   ;;  %s3164_s18 = sld [smem:[#allocation24_spill]] }
 0xb3b   : > { %s3165_s24 = sld [smem:[#allocation17_spill]]  ;;  %s3166_s25 = sld [smem:[#allocation18_spill]] }
 0xb3c   : > { %s3167_s26 = sld [smem:[#allocation27_spill]]  ;;  %s3168_s27 = sld [smem:[#allocation21_spill]] }
 0xb3d   : > { %s3169_s28 = sld [smem:[#allocation22_spill]]  ;;  %s3170_s29 = sld [smem:[#allocation23_spill]] }
 0xb3e   : > { %s3171_s30 = sld [smem:[#allocation25_spill]]  ;;  %s3172_s21 = smov %s2346_s22 }
 0xb3f   : > { %s3173_s22 = smov %s3163_s23  ;;  %33 = sbr.rel (!%p31_p5) target bundleno = 27 (0x1b), region = 186 }
 0xb40   : > { %s3174_s23 = smov %s3164_s18 }
 0xb46   :  { %1553 = vsyncpa [#allocation3], 1 }
 0xb47   :  { %1555 = vsyncpa [#allocation3 + $0x1], 1 }
 0xb48   :  { %1556 = vsyncpa [#allocation6], 1 }
 0xb49   :  { %1558 = vsyncpa [#allocation6 + $0x1], 1 }
 0xb4a   :  { %1559 = vsyncpa [#allocation9], 1 }
 0xb4b   :  { %1561 = vsyncpa [#allocation9 + $0x1], 1 }
 0xb4c   :  { %1562 = vsyncpa [#allocation4], 1 }
 0xb4d   :  { %1564 = vsyncpa [#allocation4 + $0x1], 1 }

</bundles_post_ra>
